<compile_context>
chip_gen: v7x
topology: tpu7x:2x2x1
jax: 0.10.0
libtpu: 0.0.40
codegen_flags: <defaults>
</compile_context>

<pallas_src>
import jax
import jax.numpy as jnp
from jax.experimental import pallas as pl
from jax.experimental.pallas import tpu as pltpu

INPUT_NF = 32
OUTPUT_NF = 32
HIDDEN_NF = 32
EDGES_IN_D = 2
EF_DIM = 3
COLOR_STEPS = 3
COORDS_WEIGHT = 1.0
RBOUND_UPPER = 10.0

EDGE_TILE = 128          # lane-aligned edge-tile size for the grid axis


# ----------------------------- parameters ---------------------------------- #

def _linear_init(key, fan_in, fan_out, scale=None):
    if scale is None:
        scale = 1.0 / float(fan_in) ** 0.5
    kw, kb = jax.random.split(key)
    w = jax.random.uniform(kw, (fan_in, fan_out), jnp.float32, -scale, scale)
    b = jax.random.uniform(kb, (1, fan_out), jnp.float32, -scale, scale)
    return w, b


def init_params(key):
    p = {}
    keys = iter(jax.random.split(key, 40))
    F, H, Fout, Ea = INPUT_NF, HIDDEN_NF, OUTPUT_NF, EDGES_IN_D
    din_edge = 2 * F + 1 + H + Ea
    # edge_mlp_feat: Linear(din_edge,H), ReLU, Linear(H,H), ReLU
    p['we1'], p['be1'] = _linear_init(next(keys), din_edge, H)
    p['we2'], p['be2'] = _linear_init(next(keys), H, H)
    # coord_mlp: Linear(H,H), ReLU, Linear(H,1,bias=False) with xavier gain 0.001
    p['wc1'], p['bc1'] = _linear_init(next(keys), H, H)
    lim = 0.001 * (6.0 / (H + 1)) ** 0.5
    p['wc2'] = jax.random.uniform(next(keys), (H, 1), jnp.float32, -lim, lim)
    # coord_mlp_vel: Linear(F,H), ReLU, Linear(H,1)
    p['wv1'], p['bv1'] = _linear_init(next(keys), F, H)
    p['wv2'], p['bv2'] = _linear_init(next(keys), H, 1)
    # node_mlp: Linear(H+F,H), ReLU, Linear(H,Fout)
    p['wn1'], p['bn1'] = _linear_init(next(keys), H + F, H)
    p['wn2'], p['bn2'] = _linear_init(next(keys), H, Fout)
    # mixed_wl color network (TwoFDisInit / TwoFDisLayer stand-ins)
    p['wl_init_w'], p['wl_init_b'] = _linear_init(next(keys), 4 * EF_DIM, H)
    p['wl_pat'] = 1.0 + 0.1 * jax.random.normal(next(keys), (2, H), jnp.float32)
    p['wl_mix1_w'], p['wl_mix1_b'] = _linear_init(next(keys), H, H)
    p['wl_mix2_w'], p['wl_mix2_b'] = _linear_init(next(keys), H, H)
    p['wl_layers'] = []
    for _ in range(COLOR_STEPS):
        lw = {}
        lw['w0'], lw['b0'] = _linear_init(next(keys), H, H)
        lw['w1'], lw['b1'] = _linear_init(next(keys), H, H)
        lw['w2'], lw['b2'] = _linear_init(next(keys), H, H)
        lw['wo'], lw['bo'] = _linear_init(next(keys), H, H)
        p['wl_layers'].append(lw)
    return p


# ------------------------- mixed_wl (plain JAX glue) ------------------------ #

def _rbf_nexpnorm(d):
    # TODO(synk): rbf_class_mapping['nexpnorm'] is an external dependency; an
    # exp-normal smearing with the same (num_rbf, rbound_upper) signature is used.
    means = jnp.linspace(jnp.exp(-RBOUND_UPPER), 1.0, EF_DIM)
    beta = (2.0 / EF_DIM * (1.0 - jnp.exp(-RBOUND_UPPER))) ** -2
    return jnp.exp(-beta * (jnp.exp(-d) - means) ** 2)


def mixed_wl(p, row, col, coord, vel):
    # TODO(synk): TwoFDisInit / TwoFDisLayer come from an external (kDisGNN)
    # package not provided here; re-implemented with equivalent tensor structure
    # (tuple-init MLP + per-channel 5x5 matrix mixing) in plain JAX glue.
    B = coord.shape[0] // 5
    c = coord.reshape(B, 5, 3)
    v = vel.reshape(B, 5, 3)
    norm = lambda x: jnp.sqrt(jnp.sum(x * x, axis=-1, keepdims=True))
    cd = norm(c[:, :, None, :] - c[:, None, :, :])
    vd = norm(v[:, :, None, :] - v[:, None, :, :])
    md_c = norm(c[:, :, None, :] - v[:, None, :, :])
    md_v = jnp.transpose(md_c, (0, 2, 1, 3))
    mixed = jnp.concatenate(
        [_rbf_nexpnorm(cd), _rbf_nexpnorm(vd), _rbf_nexpnorm(md_c), _rbf_nexpnorm(md_v)],
        axis=-1)                                              # (B,5,5,4*EF_DIM)
    e = mixed @ p['wl_init_w'] + p['wl_init_b']               # (B,5,5,H)
    eye = jnp.eye(5, dtype=jnp.float32)[None, :, :, None]
    pattern = p['wl_pat'][0] * (1.0 - eye) + p['wl_pat'][1] * eye
    kemb = e * pattern
    kemb = jax.nn.relu(kemb @ p['wl_mix1_w'] + p['wl_mix1_b'])
    kemb = kemb @ p['wl_mix2_w'] + p['wl_mix2_b']
    for lw in p['wl_layers']:
        k0 = jax.nn.relu(kemb @ lw['w0'] + lw['b0'])
        k1 = jax.nn.relu(kemb @ lw['w1'] + lw['b1'])
        k2 = jax.nn.relu(kemb @ lw['w2'] + lw['b2'])
        mult = jnp.einsum('bijd,bjkd->bikd', k0, k1)
        kemb = kemb + (mult * k2) @ lw['wo'] + lw['bo']
    batch = row // 5
    ri = row % 5
    ci = col % 5
    return kemb[batch, ri, ci]                                # (E,H)


# ------------------------------ Pallas kernel ------------------------------- #

def _egcl_kernel(row_ref, edge_in_ref, cdiff_ref, h_ref, coord_ref, vel_ref,
                 inv_cnt_ref, params_ref, out_ref, acc_ref):
    dot = lambda a, b: jnp.dot(a, b, preferred_element_type=jnp.float32)
    relu = lambda x: jnp.maximum(x, 0.0)
    H = HIDDEN_NF
    n_nodes = h_ref.shape[0]
    te = edge_in_ref.shape[0]
    e_idx = pl.program_id(0)

    @pl.when(e_idx == 0)
    def _():
        acc_ref[...] = jnp.zeros_like(acc_ref)

    # Lane-dense packed parameter slab; all slices are static.
    w1 = params_ref[0:128, 0:32].astype(jnp.bfloat16)    # edge MLP L1, zero-padded K=128
    we2 = params_ref[0:32, 32:64]                        # edge MLP L2
    wc1 = params_ref[32:64, 32:64]                       # coord MLP L1
    wn1a = params_ref[64:96, 32:64]                      # node MLP L1 (agg part)
    wn2 = params_ref[96:128, 32:64]                      # node MLP L2
    w_h = params_ref[0:32, 64:128]                       # [wv1 | wn1h] shared-LHS pack
    b0 = params_ref[128:129, :]
    be1, be2, bc1, bv1 = b0[:, 0:32], b0[:, 32:64], b0[:, 64:96], b0[:, 96:128]
    b1 = params_ref[129:130, :]
    bn1, bn2, wc2_row, wv2_row = b1[:, 0:32], b1[:, 32:64], b1[:, 64:96], b1[:, 96:128]
    bv2 = params_ref[130:131, 0:1]

    # Per-edge-tile: edge MLP (bf16 x bf16 MXU, f32 accum), coord MLP scalar.
    z = relu(dot(edge_in_ref[...], w1) + be1)            # (TE,H) f32
    edge_feat = relu(dot(z, we2) + be2)                  # (TE,H)
    hc = relu(dot(edge_feat, wc1) + bc1)                 # (TE,H)
    cs = jnp.sum(hc * wc2_row, axis=1, keepdims=True)    # == hc @ wc2, (TE,1)
    trans = cdiff_ref[...] * cs                          # (TE,3)

    # Fused scatter: single bf16 x bf16 matmul over [edge_feat | trans].
    # One-hot built in-kernel from row indices; pad edges carry row = -1 -> 0.
    scatter_rhs = jnp.concatenate([edge_feat, trans], axis=1).astype(jnp.bfloat16)
    node_ids = jax.lax.broadcasted_iota(jnp.int32, (n_nodes, te), 0)
    scat = (node_ids == row_ref[...]).astype(jnp.bfloat16)       # (N,TE)
    acc_ref[...] += dot(scat, scatter_rhs)                       # (N,H+3) f32 accum

    # Node-side compute + lane-dense output store, once, on the last tile.
    @pl.when(e_idx == pl.num_programs(0) - 1)
    def _():
        agg = acc_ref[...]
        agg_sum = agg[:, 0:H]                            # segment_sum(edge_feat)
        agg_mean = agg[:, H:H + 3] * inv_cnt_ref[...]    # segment_mean(trans)

        h = h_ref[...]
        hw = dot(h, w_h)                                 # one launch: [vel | node] proj
        hv = relu(hw[:, 0:H] + bv1)
        vsc = jnp.sum(hv * wv2_row, axis=1, keepdims=True) + bv2          # (N,1)
        cout = coord_ref[...] + agg_mean * COORDS_WEIGHT + vsc * vel_ref[...]

        nz = relu(hw[:, H:2 * H] + dot(agg_sum, wn1a) + bn1)
        hout = h + dot(nz, wn2) + bn2

        out_ref[...] = jnp.concatenate(
            [hout, cout, jnp.zeros((n_nodes, 128 - OUTPUT_NF - 3), jnp.float32)],
            axis=1)


# ------------------------------- wrapper ------------------------------------ #

def e_gcl_vel_feat_forward(p, h, edge_index, coord, vel, edge_attr):
    row, col = edge_index
    N, F = h.shape
    E = int(row.shape[0])
    H = HIDDEN_NF
    TE = EDGE_TILE
    n_tiles = (E + TE - 1) // TE
    E_pad = n_tiles * TE

    wl_feat = mixed_wl(p, row, col, coord, vel)               # (E,H)

    # Cheap O(E*F) index gathers (no one-hot gather matmuls).
    h_row, h_col = h[row], h[col]
    coord_diff = coord[row] - coord[col]
    radial = jnp.sum(coord_diff * coord_diff, axis=1, keepdims=True)

    # Fused, lane-dense edge-MLP input (E_pad,128), fed to the MXU in bf16.
    k_in = 2 * F + 1 + H + EDGES_IN_D                         # 99
    edge_in = jnp.concatenate([h_row, h_col, radial, wl_feat, edge_attr], axis=1)
    edge_in = jnp.pad(edge_in, ((0, E_pad - E), (0, 128 - k_in))).astype(jnp.bfloat16)
    cdiff_pad = jnp.pad(coord_diff, ((0, E_pad - E), (0, 0)))
    # Pad edges scatter to node -1 -> all-zero one-hot column (no contribution).
    row_pad = jnp.full((1, E_pad), -1, jnp.int32).at[0, :E].set(row.astype(jnp.int32))

    # Per-node inverse degree (multiply instead of divide in the kernel).
    deg = jnp.zeros((N,), jnp.float32).at[row].add(1.0)
    inv_cnt = (1.0 / jnp.maximum(deg, 1.0)).reshape(N, 1)

    # Lane-dense (136,128) parameter slab (unmasked vld; shared-LHS packing).
    w1 = jnp.concatenate([p['we1'], jnp.zeros((128 - k_in, H), jnp.float32)], axis=0)
    slab = jnp.zeros((136, 128), jnp.float32)
    slab = slab.at[0:128, 0:32].set(w1)
    slab = slab.at[0:32, 32:64].set(p['we2'])
    slab = slab.at[32:64, 32:64].set(p['wc1'])
    slab = slab.at[64:96, 32:64].set(p['wn1'][F:])            # node MLP L1, agg part
    slab = slab.at[96:128, 32:64].set(p['wn2'])
    slab = slab.at[0:32, 64:96].set(p['wv1'])                 # vel MLP L1
    slab = slab.at[0:32, 96:128].set(p['wn1'][:F])            # node MLP L1, h part
    slab = slab.at[128, 0:32].set(p['be1'][0])
    slab = slab.at[128, 32:64].set(p['be2'][0])
    slab = slab.at[128, 64:96].set(p['bc1'][0])
    slab = slab.at[128, 96:128].set(p['bv1'][0])
    slab = slab.at[129, 0:32].set(p['bn1'][0])
    slab = slab.at[129, 32:64].set(p['bn2'][0])
    slab = slab.at[129, 64:96].set(p['wc2'][:, 0])
    slab = slab.at[129, 96:128].set(p['wv2'][:, 0])
    slab = slab.at[130, 0].set(p['bv2'][0, 0])

    flops = int(2 * E_pad * 128 * H + 4 * E_pad * H * H + 2 * E_pad * H    # edge+coord MLPs
                + 2 * N * E_pad * (H + 3)                                  # fused scatter
                + 2 * N * F * 2 * H + 2 * N * H * H                        # h-proj + agg-proj
                + 2 * N * H * OUTPUT_NF + 2 * N * H)                       # node L2 + vel head
    bytes_accessed = int(2 * E_pad * 128 + 4 * E_pad * 3 + 4 * E_pad
                         + 4 * (N * (F + 3 + 3 + 1) + 136 * 128 + N * 128))

    grid_spec = pltpu.PrefetchScalarGridSpec(
        num_scalar_prefetch=0,
        grid=(n_tiles,),
        in_specs=[
            pl.BlockSpec((1, TE), lambda e: (0, e)),          # row indices (int32)
            pl.BlockSpec((TE, 128), lambda e: (e, 0)),        # edge_in (bf16)
            pl.BlockSpec((TE, 3), lambda e: (e, 0)),          # coord_diff
            pl.BlockSpec((N, F), lambda e: (0, 0)),           # h (resident)
            pl.BlockSpec((N, 3), lambda e: (0, 0)),           # coord (resident)
            pl.BlockSpec((N, 3), lambda e: (0, 0)),           # vel (resident)
            pl.BlockSpec((N, 1), lambda e: (0, 0)),           # inverse degree
            pl.BlockSpec((136, 128), lambda e: (0, 0)),       # params slab
        ],
        out_specs=pl.BlockSpec((N, 128), lambda e: (0, 0)),   # [h_out | coord_out | 0]
        scratch_shapes=[pltpu.VMEM((N, H + 3), jnp.float32)],
    )

    out_slab = pl.pallas_call(
        _egcl_kernel,
        out_shape=jax.ShapeDtypeStruct((N, 128), jnp.float32),
        grid_spec=grid_spec,
        cost_estimate=pl.CostEstimate(flops=flops, transcendentals=0,
                                      bytes_accessed=bytes_accessed),
        compiler_params=pltpu.CompilerParams(
            dimension_semantics=("arbitrary",),
            # TODO(synk): re-derive TE/vmem per generation (v7x 64 MiB VMEM) and
            # add a per-graph "parallel" axis for v7x's 2 TensorCores.
            vmem_limit_bytes=32 * 1024 * 1024),
    )(row_pad, edge_in, cdiff_pad, h, coord, vel, inv_cnt, slab)

    h_out = out_slab[:, :OUTPUT_NF]
    coord_out = out_slab[:, OUTPUT_NF:OUTPUT_NF + 3]
    return h_out, coord_out, edge_attr


# ------------------------- pure-JAX reference (check) ----------------------- #

def e_gcl_vel_feat_reference(p, h, edge_index, coord, vel, edge_attr):
    row, col = edge_index
    N = h.shape[0]
    E = row.shape[0]
    relu = jax.nn.relu
    coord_diff = coord[row] - coord[col]
    radial = jnp.sum(coord_diff ** 2, axis=1, keepdims=True)
    wl_feat = mixed_wl(p, row, col, coord, vel)
    edge_in = jnp.concatenate([h[row], h[col], radial, wl_feat, edge_attr], axis=1)
    edge_feat = relu(relu(edge_in @ p['we1'] + p['be1']) @ p['we2'] + p['be2'])
    cs = relu(edge_feat @ p['wc1'] + p['bc1']) @ p['wc2']
    trans = coord_diff * cs
    ssum = jnp.zeros((N, 3), jnp.float32).at[row].add(trans)
    cnt = jnp.zeros((N, 1), jnp.float32).at[row].add(jnp.ones((E, 1), jnp.float32))
    coord_new = coord + (ssum / jnp.maximum(cnt, 1.0)) * COORDS_WEIGHT
    vsc = relu(h @ p['wv1'] + p['bv1']) @ p['wv2'] + p['bv2']
    coord_new = coord_new + vsc * vel
    agg = jnp.zeros((N, HIDDEN_NF), jnp.float32).at[row].add(edge_feat)
    nz = relu(jnp.concatenate([h, agg], axis=1) @ p['wn1'] + p['bn1'])
    h_new = h + nz @ p['wn2'] + p['bn2']
    return h_new, coord_new


# --------------------------------- main -------------------------------------- #

if __name__ == "__main__":
    key = jax.random.PRNGKey(0)
    kp, kh, kc, kv, ke = jax.random.split(key, 5)
    params = init_params(kp)

    n_graphs, nodes_per_graph = 2, 5        # mixed_wl requires N % 5 == 0
    N = n_graphs * nodes_per_graph
    h = jax.random.normal(kh, (N, INPUT_NF), jnp.float32)
    coord = jax.random.normal(kc, (N, 3), jnp.float32)
    vel = jax.random.normal(kv, (N, 3), jnp.float32)

    rows, cols = [], []
    for g in range(n_graphs):
        for i in range(nodes_per_graph):
            for j in range(nodes_per_graph):
                if i != j:
                    rows.append(g * nodes_per_graph + i)
                    cols.append(g * nodes_per_graph + j)
    row = jnp.asarray(rows, jnp.int32)
    col = jnp.asarray(cols, jnp.int32)
    edge_attr = jax.random.normal(ke, (row.shape[0], EDGES_IN_D), jnp.float32)

    fwd = jax.jit(e_gcl_vel_feat_forward)
    h_out, coord_out, ea_out = fwd(params, h, (row, col), coord, vel, edge_attr)
    jax.block_until_ready((h_out, coord_out))

    h_ref, coord_ref = e_gcl_vel_feat_reference(
        params, h, (row, col), coord, vel, edge_attr)

    assert h_out.shape == (N, OUTPUT_NF)
    assert coord_out.shape == (N, 3)
    assert bool(jnp.all(jnp.isfinite(h_out))) and bool(jnp.all(jnp.isfinite(coord_out)))
    assert bool(jnp.allclose(h_out, h_ref, rtol=2e-2, atol=2e-2))
    assert bool(jnp.allclose(coord_out, coord_ref, rtol=2e-2, atol=2e-2))
    print("KERNEL_OK")
</pallas_src>

<mosaic_0001>
module attributes {stable_mosaic.version = 11 : i64} {
  func.func @_egcl_kernel(%arg0: i32, %arg1: memref<1x128xi32, #tpu.memory_space<vmem>>, %arg2: memref<128x128xbf16, #tpu.memory_space<vmem>>, %arg3: memref<128x3xf32, #tpu.memory_space<vmem>>, %arg4: memref<10x32xf32, #tpu.memory_space<vmem>>, %arg5: memref<10x3xf32, #tpu.memory_space<vmem>>, %arg6: memref<10x3xf32, #tpu.memory_space<vmem>>, %arg7: memref<10x1xf32, #tpu.memory_space<vmem>>, %arg8: memref<136x128xf32, #tpu.memory_space<vmem>>, %arg9: memref<10x128xf32, #tpu.memory_space<vmem>>, %arg10: memref<10x35xf32, #tpu.memory_space<vmem>>) attributes {dimension_semantics = [#tpu.dimension_semantics<arbitrary>], iteration_bounds = array<i64: 1>, scalar_prefetch = 0 : i64, scratch_operands = 1 : i64, tpu.core_type = #tpu.core_type<tc>, window_params = [{transform_indices = @transform_0, window_bounds = array<i64: 1, 128>}, {transform_indices = @transform_1, window_bounds = array<i64: 128, 128>}, {transform_indices = @transform_2, window_bounds = array<i64: 128, 3>}, {pipeline_mode = #tpu.pipeline_mode<synchronous>, transform_indices = @transform_3, window_bounds = array<i64: 10, 32>}, {pipeline_mode = #tpu.pipeline_mode<synchronous>, transform_indices = @transform_4, window_bounds = array<i64: 10, 3>}, {pipeline_mode = #tpu.pipeline_mode<synchronous>, transform_indices = @transform_5, window_bounds = array<i64: 10, 3>}, {pipeline_mode = #tpu.pipeline_mode<synchronous>, transform_indices = @transform_6, window_bounds = array<i64: 10, 1>}, {pipeline_mode = #tpu.pipeline_mode<synchronous>, transform_indices = @transform_7, window_bounds = array<i64: 136, 128>}, {pipeline_mode = #tpu.pipeline_mode<synchronous>, transform_indices = @transform_8, window_bounds = array<i64: 10, 128>}]} {
    %c0_i32 = arith.constant 0 : i32
    %0 = arith.cmpi eq, %arg0, %c0_i32 : i32
    %1 = arith.extui %0 : i1 to i32
    %c0_i32_0 = arith.constant 0 : i32
    %2 = arith.cmpi ne, %1, %c0_i32_0 : i32
    scf.if %2 {
      %cst_31 = arith.constant 0.000000e+00 : f32
      %60 = vector.broadcast %cst_31 : f32 to vector<10x35xf32>
      %c0_32 = arith.constant 0 : index
      %c0_33 = arith.constant 0 : index
      %61 = vector.load %arg10[%c0_32, %c0_33] : memref<10x35xf32, #tpu.memory_space<vmem>>, vector<10x35xf32>
      tpu.vector_store %arg10[%c0_32, %c0_33], %60 {strides = array<i32>} : memref<10x35xf32, #tpu.memory_space<vmem>>, vector<10x35xf32>,
    } else {
    }
    %c0 = arith.constant 0 : index
    %c0_1 = arith.constant 0 : index
    %3 = vector.load %arg8[%c0, %c0_1] : memref<136x128xf32, #tpu.memory_space<vmem>>, vector<128x32xf32>
    %4 = arith.truncf %3 : vector<128x32xf32> to vector<128x32xbf16>
    %c0_2 = arith.constant 0 : index
    %c32 = arith.constant 32 : index
    %5 = vector.load %arg8[%c0_2, %c32] : memref<136x128xf32, #tpu.memory_space<vmem>>, vector<32x32xf32>
    %c32_3 = arith.constant 32 : index
    %c32_4 = arith.constant 32 : index
    %6 = vector.load %arg8[%c32_3, %c32_4] : memref<136x128xf32, #tpu.memory_space<vmem>>, vector<32x32xf32>
    %c64 = arith.constant 64 : index
    %c32_5 = arith.constant 32 : index
    %7 = vector.load %arg8[%c64, %c32_5] : memref<136x128xf32, #tpu.memory_space<vmem>>, vector<32x32xf32>
    %c96 = arith.constant 96 : index
    %c32_6 = arith.constant 32 : index
    %8 = vector.load %arg8[%c96, %c32_6] : memref<136x128xf32, #tpu.memory_space<vmem>>, vector<32x32xf32>
    %c0_7 = arith.constant 0 : index
    %c64_8 = arith.constant 64 : index
    %9 = vector.load %arg8[%c0_7, %c64_8] : memref<136x128xf32, #tpu.memory_space<vmem>>, vector<32x64xf32>
    %c128 = arith.constant 128 : index
    %c0_9 = arith.constant 0 : index
    %10 = vector.load %arg8[%c128, %c0_9] : memref<136x128xf32, #tpu.memory_space<vmem>>, vector<1x128xf32>
    %11 = vector.extract_strided_slice %10 {offsets = [0, 0], sizes = [1, 32], strides = [1, 1]} : vector<1x128xf32> to vector<1x32xf32>
    %12 = vector.extract_strided_slice %10 {offsets = [0, 32], sizes = [1, 32], strides = [1, 1]} : vector<1x128xf32> to vector<1x32xf32>
    %13 = vector.extract_strided_slice %10 {offsets = [0, 64], sizes = [1, 32], strides = [1, 1]} : vector<1x128xf32> to vector<1x32xf32>
    %14 = vector.extract_strided_slice %10 {offsets = [0, 96], sizes = [1, 32], strides = [1, 1]} : vector<1x128xf32> to vector<1x32xf32>
    %c129 = arith.constant 129 : index
    %c0_10 = arith.constant 0 : index
    %15 = vector.load %arg8[%c129, %c0_10] : memref<136x128xf32, #tpu.memory_space<vmem>>, vector<1x128xf32>
    %16 = vector.extract_strided_slice %15 {offsets = [0, 0], sizes = [1, 32], strides = [1, 1]} : vector<1x128xf32> to vector<1x32xf32>
    %17 = vector.extract_strided_slice %15 {offsets = [0, 32], sizes = [1, 32], strides = [1, 1]} : vector<1x128xf32> to vector<1x32xf32>
    %18 = vector.extract_strided_slice %15 {offsets = [0, 64], sizes = [1, 32], strides = [1, 1]} : vector<1x128xf32> to vector<1x32xf32>
    %19 = vector.extract_strided_slice %15 {offsets = [0, 96], sizes = [1, 32], strides = [1, 1]} : vector<1x128xf32> to vector<1x32xf32>
    %c130 = arith.constant 130 : index
    %c0_11 = arith.constant 0 : index
    %20 = vector.load %arg8[%c130, %c0_11] : memref<136x128xf32, #tpu.memory_space<vmem>>, vector<1x1xf32>
    %c0_12 = arith.constant 0 : index
    %c0_13 = arith.constant 0 : index
    %21 = vector.load %arg2[%c0_12, %c0_13] : memref<128x128xbf16, #tpu.memory_space<vmem>>, vector<128x128xbf16>
    %cst = arith.constant dense<0.000000e+00> : vector<128x32xf32>
    %22 = tpu.matmul %21, %4, %cst {dimension_numbers = #tpu.dot_dimension_numbers<[1], [0], [0], [1], [0, 0, 1, 1], [], []>} : vector<128x128xbf16>, vector<128x32xbf16>, vector<128x32xf32> -> vector<128x32xf32>
    %23 = vector.broadcast %11 : vector<1x32xf32> to vector<128x32xf32>
    %24 = arith.addf %22, %23 : vector<128x32xf32>
    %cst_14 = arith.constant 0.000000e+00 : f32
    %25 = vector.broadcast %cst_14 : f32 to vector<128x32xf32>
    %26 = arith.maximumf %24, %25 : vector<128x32xf32>
    %cst_15 = arith.constant dense<0.000000e+00> : vector<128x32xf32>
    %27 = tpu.matmul %26, %5, %cst_15 {dimension_numbers = #tpu.dot_dimension_numbers<[1], [0], [0], [1], [0, 0, 1, 1], [], []>} : vector<128x32xf32>, vector<32x32xf32>, vector<128x32xf32> -> vector<128x32xf32>
    %28 = vector.broadcast %12 : vector<1x32xf32> to vector<128x32xf32>
    %29 = arith.addf %27, %28 : vector<128x32xf32>
    %cst_16 = arith.constant 0.000000e+00 : f32
    %30 = vector.broadcast %cst_16 : f32 to vector<128x32xf32>
    %31 = arith.maximumf %29, %30 : vector<128x32xf32>
    %cst_17 = arith.constant dense<0.000000e+00> : vector<128x32xf32>
    %32 = tpu.matmul %31, %6, %cst_17 {dimension_numbers = #tpu.dot_dimension_numbers<[1], [0], [0], [1], [0, 0, 1, 1], [], []>} : vector<128x32xf32>, vector<32x32xf32>, vector<128x32xf32> -> vector<128x32xf32>
    %33 = vector.broadcast %13 : vector<1x32xf32> to vector<128x32xf32>
    %34 = arith.addf %32, %33 : vector<128x32xf32>
    %cst_18 = arith.constant 0.000000e+00 : f32
    %35 = vector.broadcast %cst_18 : f32 to vector<128x32xf32>
    %36 = arith.maximumf %34, %35 : vector<128x32xf32>
    %37 = vector.broadcast %18 : vector<1x32xf32> to vector<128x32xf32>
    %38 = arith.mulf %36, %37 : vector<128x32xf32>
    %cst_19 = arith.constant dense<0.000000e+00> : vector<128xf32>
    %39 = vector.multi_reduction <add>, %38, %cst_19 [1] : vector<128x32xf32> to vector<128xf32>
    %40 = vector.shape_cast %39 : vector<128xf32> to vector<128x1xf32>
    %c0_20 = arith.constant 0 : index
    %c0_21 = arith.constant 0 : index
    %41 = vector.load %arg3[%c0_20, %c0_21] : memref<128x3xf32, #tpu.memory_space<vmem>>, vector<128x3xf32>
    %42 = vector.broadcast %40 : vector<128x1xf32> to vector<128x3xf32>
    %43 = arith.mulf %41, %42 : vector<128x3xf32>
    %44 = tpu.concatenate %31, %43 in 1 : vector<128x32xf32>, vector<128x3xf32> -> vector<128x35xf32>
    %45 = arith.truncf %44 : vector<128x35xf32> to vector<128x35xbf16>
    %46 = tpu.iota {dimensions = array<i32: 0>} : vector<10x128xi32>
    %c0_22 = arith.constant 0 : index
    %c0_23 = arith.constant 0 : index
    %47 = vector.load %arg1[%c0_22, %c0_23] : memref<1x128xi32, #tpu.memory_space<vmem>>, vector<1x128xi32>
    %48 = vector.broadcast %47 : vector<1x128xi32> to vector<10x128xi32>
    %49 = arith.cmpi eq, %46, %48 : vector<10x128xi32>
    %50 = arith.extui %49 : vector<10x128xi1> to vector<10x128xi32>
    %51 = arith.sitofp %50 : vector<10x128xi32> to vector<10x128xf32>
    %52 = arith.truncf %51 : vector<10x128xf32> to vector<10x128xbf16>
    %c0_24 = arith.constant 0 : index
    %c0_25 = arith.constant 0 : index
    %53 = vector.load %arg10[%c0_24, %c0_25] : memref<10x35xf32, #tpu.memory_space<vmem>>, vector<10x35xf32>
    %cst_26 = arith.constant dense<0.000000e+00> : vector<10x35xf32>
    %54 = tpu.matmul %52, %45, %cst_26 {dimension_numbers = #tpu.dot_dimension_numbers<[1], [0], [0], [1], [0, 0, 1, 1], [], []>} : vector<10x128xbf16>, vector<128x35xbf16>, vector<10x35xf32> -> vector<10x35xf32>
    %55 = arith.addf %53, %54 : vector<10x35xf32>
    %c0_27 = arith.constant 0 : index
    %c0_28 = arith.constant 0 : index
    %56 = vector.load %arg10[%c0_27, %c0_28] : memref<10x35xf32, #tpu.memory_space<vmem>>, vector<10x35xf32>
    tpu.vector_store %arg10[%c0_27, %c0_28], %55 {strides = array<i32>} : memref<10x35xf32, #tpu.memory_space<vmem>>, vector<10x35xf32>,
    %c0_i32_29 = arith.constant 0 : i32
    %57 = arith.cmpi eq, %arg0, %c0_i32_29 : i32
    %58 = arith.extui %57 : i1 to i32
    %c0_i32_30 = arith.constant 0 : i32
    %59 = arith.cmpi ne, %58, %c0_i32_30 : i32
    scf.if %59 {
      %c0_31 = arith.constant 0 : index
      %c0_32 = arith.constant 0 : index
      %60 = vector.load %arg10[%c0_31, %c0_32] : memref<10x35xf32, #tpu.memory_space<vmem>>, vector<10x35xf32>
      %61 = vector.extract_strided_slice %60 {offsets = [0, 0], sizes = [10, 32], strides = [1, 1]} : vector<10x35xf32> to vector<10x32xf32>
      %62 = vector.extract_strided_slice %60 {offsets = [0, 32], sizes = [10, 3], strides = [1, 1]} : vector<10x35xf32> to vector<10x3xf32>
      %c0_33 = arith.constant 0 : index
      %c0_34 = arith.constant 0 : index
      %63 = vector.load %arg7[%c0_33, %c0_34] : memref<10x1xf32, #tpu.memory_space<vmem>>, vector<10x1xf32>
      %64 = vector.broadcast %63 : vector<10x1xf32> to vector<10x3xf32>
      %65 = arith.mulf %62, %64 : vector<10x3xf32>
      %c0_35 = arith.constant 0 : index
      %c0_36 = arith.constant 0 : index
      %66 = vector.load %arg4[%c0_35, %c0_36] : memref<10x32xf32, #tpu.memory_space<vmem>>, vector<10x32xf32>
      %cst_37 = arith.constant dense<0.000000e+00> : vector<10x64xf32>
      %67 = tpu.matmul %66, %9, %cst_37 {dimension_numbers = #tpu.dot_dimension_numbers<[1], [0], [0], [1], [0, 0, 1, 1], [], []>} : vector<10x32xf32>, vector<32x64xf32>, vector<10x64xf32> -> vector<10x64xf32>
      %68 = vector.extract_strided_slice %67 {offsets = [0, 0], sizes = [10, 32], strides = [1, 1]} : vector<10x64xf32> to vector<10x32xf32>
      %69 = vector.broadcast %14 : vector<1x32xf32> to vector<10x32xf32>
      %70 = arith.addf %68, %69 : vector<10x32xf32>
      %cst_38 = arith.constant 0.000000e+00 : f32
      %71 = vector.broadcast %cst_38 : f32 to vector<10x32xf32>
      %72 = arith.maximumf %70, %71 : vector<10x32xf32>
      %73 = vector.broadcast %19 : vector<1x32xf32> to vector<10x32xf32>
      %74 = arith.mulf %72, %73 : vector<10x32xf32>
      %cst_39 = arith.constant dense<0.000000e+00> : vector<10xf32>
      %75 = vector.multi_reduction <add>, %74, %cst_39 [1] : vector<10x32xf32> to vector<10xf32>
      %76 = vector.shape_cast %75 : vector<10xf32> to vector<10x1xf32>
      %77 = vector.broadcast %20 : vector<1x1xf32> to vector<10x1xf32>
      %78 = arith.addf %76, %77 : vector<10x1xf32>
      %c0_40 = arith.constant 0 : index
      %c0_41 = arith.constant 0 : index
      %79 = vector.load %arg5[%c0_40, %c0_41] : memref<10x3xf32, #tpu.memory_space<vmem>>, vector<10x3xf32>
      %cst_42 = arith.constant 1.000000e+00 : f32
      %80 = vector.broadcast %cst_42 : f32 to vector<10x3xf32>
      %81 = arith.mulf %65, %80 : vector<10x3xf32>
      %82 = arith.addf %79, %81 : vector<10x3xf32>
      %c0_43 = arith.constant 0 : index
      %c0_44 = arith.constant 0 : index
      %83 = vector.load %arg6[%c0_43, %c0_44] : memref<10x3xf32, #tpu.memory_space<vmem>>, vector<10x3xf32>
      %84 = vector.broadcast %78 : vector<10x1xf32> to vector<10x3xf32>
      %85 = arith.mulf %84, %83 : vector<10x3xf32>
      %86 = arith.addf %82, %85 : vector<10x3xf32>
      %87 = vector.extract_strided_slice %67 {offsets = [0, 32], sizes = [10, 32], strides = [1, 1]} : vector<10x64xf32> to vector<10x32xf32>
      %cst_45 = arith.constant dense<0.000000e+00> : vector<10x32xf32>
      %88 = tpu.matmul %61, %7, %cst_45 {dimension_numbers = #tpu.dot_dimension_numbers<[1], [0], [0], [1], [0, 0, 1, 1], [], []>} : vector<10x32xf32>, vector<32x32xf32>, vector<10x32xf32> -> vector<10x32xf32>
      %89 = arith.addf %87, %88 : vector<10x32xf32>
      %90 = vector.broadcast %16 : vector<1x32xf32> to vector<10x32xf32>
      %91 = arith.addf %89, %90 : vector<10x32xf32>
      %cst_46 = arith.constant 0.000000e+00 : f32
      %92 = vector.broadcast %cst_46 : f32 to vector<10x32xf32>
      %93 = arith.maximumf %91, %92 : vector<10x32xf32>
      %cst_47 = arith.constant dense<0.000000e+00> : vector<10x32xf32>
      %94 = tpu.matmul %93, %8, %cst_47 {dimension_numbers = #tpu.dot_dimension_numbers<[1], [0], [0], [1], [0, 0, 1, 1], [], []>} : vector<10x32xf32>, vector<32x32xf32>, vector<10x32xf32> -> vector<10x32xf32>
      %95 = arith.addf %66, %94 : vector<10x32xf32>
      %96 = vector.broadcast %17 : vector<1x32xf32> to vector<10x32xf32>
      %97 = arith.addf %95, %96 : vector<10x32xf32>
      %cst_48 = arith.constant 0.000000e+00 : f32
      %98 = vector.broadcast %cst_48 : f32 to vector<10x93xf32>
      %99 = tpu.concatenate %97, %86, %98 in 1 : vector<10x32xf32>, vector<10x3xf32>, vector<10x93xf32> -> vector<10x128xf32>
      %c0_49 = arith.constant 0 : index
      %c0_50 = arith.constant 0 : index
      %100 = vector.load %arg9[%c0_49, %c0_50] : memref<10x128xf32, #tpu.memory_space<vmem>>, vector<10x128xf32>
      tpu.vector_store %arg9[%c0_49, %c0_50], %99 {strides = array<i32>} : memref<10x128xf32, #tpu.memory_space<vmem>>, vector<10x128xf32>,
    } else {
    }
    return
  }
  func.func @transform_0(%arg0: i32) -> (i32, i32) {
    %c0_i32 = arith.constant 0 : i32
    %c0_i32_0 = arith.constant 0 : i32
    return %c0_i32, %arg0 : i32, i32
  }
  func.func @transform_1(%arg0: i32) -> (i32, i32) {
    %c0_i32 = arith.constant 0 : i32
    %c0_i32_0 = arith.constant 0 : i32
    return %arg0, %c0_i32 : i32, i32
  }
  func.func @transform_2(%arg0: i32) -> (i32, i32) {
    %c0_i32 = arith.constant 0 : i32
    %c0_i32_0 = arith.constant 0 : i32
    return %arg0, %c0_i32 : i32, i32
  }
  func.func @transform_3(%arg0: i32) -> (i32, i32) {
    %c0_i32 = arith.constant 0 : i32
    %c0_i32_0 = arith.constant 0 : i32
    %c0_i32_1 = arith.constant 0 : i32
    return %c0_i32, %c0_i32_0 : i32, i32
  }
  func.func @transform_4(%arg0: i32) -> (i32, i32) {
    %c0_i32 = arith.constant 0 : i32
    %c0_i32_0 = arith.constant 0 : i32
    %c0_i32_1 = arith.constant 0 : i32
    return %c0_i32, %c0_i32_0 : i32, i32
  }
  func.func @transform_5(%arg0: i32) -> (i32, i32) {
    %c0_i32 = arith.constant 0 : i32
    %c0_i32_0 = arith.constant 0 : i32
    %c0_i32_1 = arith.constant 0 : i32
    return %c0_i32, %c0_i32_0 : i32, i32
  }
  func.func @transform_6(%arg0: i32) -> (i32, i32) {
    %c0_i32 = arith.constant 0 : i32
    %c0_i32_0 = arith.constant 0 : i32
    %c0_i32_1 = arith.constant 0 : i32
    return %c0_i32, %c0_i32_0 : i32, i32
  }
  func.func @transform_7(%arg0: i32) -> (i32, i32) {
    %c0_i32 = arith.constant 0 : i32
    %c0_i32_0 = arith.constant 0 : i32
    %c0_i32_1 = arith.constant 0 : i32
    return %c0_i32, %c0_i32_0 : i32, i32
  }
  func.func @transform_8(%arg0: i32) -> (i32, i32) {
    %c0_i32 = arith.constant 0 : i32
    %c0_i32_0 = arith.constant 0 : i32
    %c0_i32_1 = arith.constant 0 : i32
    return %c0_i32, %c0_i32_0 : i32, i32
  }
}

</mosaic_0001>

<bundles_post_ra>
// kernel: sub.58
= control target key start
LH: loop header
LB: loop body
LE: loop exit
PB: predicated region body
PF: predicated region fallthrough
CT: control target
= control target key end

     0   :  { %vm7_vm0 = vcmask 39936   ;;  %s59_s0 = inlined_call_operand.vmem [shape: f32[10,3], index: 0, kind: input, shape index: {}]   ;;  %s60_s1 = inlined_call_operand.vmem [shape: f32[2,5,3], index: 1, kind: output, shape index: {}]  }
   0x1   :  { %v4_v0 = vld [vmem:[%s59_s0] sm:$0xf]  ;;  %s36_s0 = smov 123  }
   0x2   :  { %5 = vst [vmem:[#allocation1] sm:$0xf] %v4_v0 }
   0x9   :  { %v9_v1 = vld [vmem:[#allocation1] sm:$0x7]  }
   0xa   :  { %v6_v2 = vld [vmem:[#allocation1] sm:$0x7]   ;;  %10 = vrot.lane.b32.xlu0 %v9_v1, %s36_s0 }
   0xb   :  { %8 = vst.msk [vmem:[#allocation0] ss:$8 sm:$0x7] %vm7_vm0, %v6_v2  }
  0x7c   :  { %v11_v3 = vpop.permute.xlu0 %10  }
  0x7d   :  { %14 = vst.msk [vmem:[#allocation0 + $0x1] ss:$8 sm:$0x7] %vm7_vm0, %v11_v3  }
  0x84   :  { %v18_v4 = vld [vmem:[#allocation0] sm:$0x3]  ;;  %v22_v5 = vld [vmem:[#allocation0 + $0x8] sm:$0x3]  ;;  %v27_v6 = vld [vmem:[#allocation0 + $0x10] sm:$0x3] }
  0x85   :  { %20 = vst [vmem:[%s60_s1] sm:$0x3] %v18_v4  ;;  %33 = vst [vmem:[%s60_s1 + $0x2] sm:$0x3] %v22_v5 }
  0x86   :  { %34 = vst [vmem:[%s60_s1 + $0x4] sm:$0x3] %v27_v6 }

// kernel: e_gcl_vel_feat_forward.1
= control target key start
LH: loop header
LB: loop body
LE: loop exit
PB: predicated region body
PF: predicated region fallthrough
CT: control target
= control target key end

     0   :  { %s1797_s17 = smov 96   ;;  %vm266_vm0 = vcmask 261120   ;;  %s1798_s14 = smov 64   ;;  %vm1801_vm1 = vmmov 0   ;;  %vm34_vm2 = vcmask 285696   ;;  %vm36_vm6 = vcmask 279552   ;;  %s2375_s7 = inlined_call_operand.vmem [shape: f32[136,128], index: 7, kind: input, shape index: {}]   ;;  %s2376_s1 = inlined_call_operand.vmem [shape: bf16[128,128], index: 1, kind: input, shape index: {}]   ;;  %s2377_s2 = inlined_call_operand.vmem [shape: f32[128,3], index: 2, kind: input, shape index: {}]   ;;  %s2378_s0 = inlined_call_operand.vmem [shape: s32[1,128], index: 0, kind: input, shape index: {}]   ;;  %s2379_s3 = inlined_call_operand.vmem [shape: f32[10,32], index: 3, kind: input, shape index: {}]   ;;  %s2380_s6 = inlined_call_operand.vmem [shape: f32[10,1], index: 6, kind: input, shape index: {}]   ;;  %s2381_s5 = inlined_call_operand.vmem [shape: f32[10,3], index: 5, kind: input, shape index: {}]   ;;  %s2382_s4 = inlined_call_operand.vmem [shape: f32[10,3], index: 4, kind: input, shape index: {}]   ;;  %s2383_s8 = inlined_call_operand.vmem [shape: f32[10,128], index: 8, kind: output, shape index: {}]  }
   0x1   :  { %v38_v0 = vld [vmem:[%s2375_s7] sm:$0xff]  ;;  %v39_v1 = vld [vmem:[%s2375_s7 + $0x8] sm:$0xff]  ;;  %v40_v2 = vld [vmem:[%s2375_s7 + $0x10] sm:$0xff]  ;;  %s1800_s24 = smov 32   ;;  %vm1089_vm7 = vcmask 254976  }
   0x2   :  { %v54_v3 = vpack.c.bf16 %v39_v1, %v38_v0  ;;  %v41_v4 = vld [vmem:[%s2375_s7 + $0x18] sm:$0xff]  ;;  %v1861_v5 = vpack.i.bf16 %v39_v1, %v38_v0  ;;  %v1866_v7 = vld [vmem:[%s2375_s7 + $0x20] sm:$0xff]  ;;  %v1871_v8 = vld [vmem:[%s2375_s7 + $0x28] sm:$0xff] }
   0x3   :  { %v55_v6 = vpack.c.bf16 %v41_v4, %v40_v2  ;;  %v1875_v9 = vpack.i.bf16 %v41_v4, %v40_v2  ;;  %v1880_v10 = vld [vmem:[%s2375_s7 + $0x30] sm:$0xff]  ;;  %v56_v11 = vpack.c.bf16 %v1871_v8, %v1866_v7  ;;  %v45_v12 = vld [vmem:[%s2375_s7 + $0x38] sm:$0xff]  ;;  %v1789_v13 = vld [vmem:[%s2376_s1] sm:$0xff]   ;;  %v1707_v43 = vpack.i.bf16 %v1871_v8, %v1866_v7 }
   0x4   :  { %1501 = vmatprep.subr.bf16.mxu0 %v54_v3  ;;  %1698 = vrot.lane.b32.xlu0 %v1861_v5, %s1797_s17  ;;  %v57_v14 = vpack.c.bf16 %v45_v12, %v1880_v10  ;;  %v1896_v15 = vld [vmem:[%s2375_s7 + $0x40] sm:$0xff]  ;;  %v1901_v16 = vld [vmem:[%s2375_s7 + $0x48] sm:$0xff]  ;;  %v1908_v18 = vld [vmem:[%s2375_s7 + $0x50] sm:$0xff]  ;;  %v1712_v44 = vpack.i.bf16 %v45_v12, %v1880_v10 }
   0x5   :  { %1502 = vmatpush3.bf16.msra.mxu0 %v54_v3  ;;  %1517 = vmatprep.mubr.bf16.mxu0 %v1789_v13  ;;  %v58_v17 = vpack.c.bf16 %v1901_v16, %v1896_v15  ;;  %v1913_v19 = vld [vmem:[%s2375_s7 + $0x58] sm:$0xff]  ;;  %v1920_v21 = vld [vmem:[%s2375_s7 + $0x60] sm:$0xff]  ;;  %v1925_v22 = vld [vmem:[%s2375_s7 + $0x68] sm:$0xff] }
   0x6   :  { %1503 = vmatprep.subr.bf16.mxu0 %v55_v6  ;;  %v59_v20 = vpack.c.bf16 %v1913_v19, %v1908_v18  ;;  %v60_v23 = vpack.c.bf16 %v1925_v22, %v1920_v21  ;;  %v1932_v24 = vld [vmem:[%s2375_s7 + $0x70] sm:$0xff]  ;;  %v1937_v25 = vld [vmem:[%s2375_s7 + $0x78] sm:$0xff]  ;;  %v1790_v27 = vld [vmem:[%s2376_s1 + $0x8] sm:$0xff]   ;;  %1708 = vrot.lane.b32.xlu1 %v1707_v43, %s1797_s17 }
   0x7   :  { %v61_v26 = vpack.c.bf16 %v1937_v25, %v1932_v24  ;;  %v1791_v28 = vld [vmem:[%s2376_s1 + $0x10] sm:$0xff]   ;;  %v1792_v29 = vld [vmem:[%s2376_s1 + $0x18] sm:$0xff]   ;;  %v1793_v30 = vld [vmem:[%s2376_s1 + $0x20] sm:$0xff]  }
   0x8   :  { %1703 = vrot.lane.b32.xlu0 %v1875_v9, %s1797_s17  ;;  %v1794_v31 = vld [vmem:[%s2376_s1 + $0x28] sm:$0xff]   ;;  %v1795_v32 = vld [vmem:[%s2376_s1 + $0x30] sm:$0xff]   ;;  %v1796_v33 = vld [vmem:[%s2376_s1 + $0x38] sm:$0xff]  }
   0x9   :  { %1504 = vmatpush3.bf16.msra.mxu0 %v55_v6  ;;  %v1965_v37 = vld [vmem:[%s2375_s7 + $0x80] ss:$0 sm:$0xff] }
   0xa   :  { %1505 = vmatprep.subr.bf16.mxu0 %v56_v11  ;;  %1713 = vrot.lane.b32.xlu1 %v1712_v44, %s1797_s17 }
   0xc   :  { %263 = vrot.lane.b32.xlu0 %v1965_v37, %s1797_s17 }
   0xd   :  { %1506 = vmatpush3.bf16.msra.mxu0 %v56_v11 }
   0xe   :  { %1507 = vmatprep.subr.bf16.mxu0 %v57_v14  ;;  %492 = vrot.lane.b32.xlu1 %v1965_v37, %s1798_s14 }
  0x11   :  { %1508 = vmatpush3.bf16.msra.mxu0 %v57_v14 }
  0x12   :  { %1509 = vmatprep.subr.bf16.mxu0 %v58_v17 }
  0x15   :  { %1510 = vmatpush3.bf16.msra.mxu0 %v58_v17 }
  0x16   :  { %1511 = vmatprep.subr.bf16.mxu0 %v59_v20 }
  0x19   :  { %1512 = vmatpush3.bf16.msra.mxu0 %v59_v20 }
  0x1a   :  { %1513 = vmatprep.subr.bf16.mxu0 %v60_v23 }
  0x1d   :  { %1514 = vmatpush3.bf16.msra.mxu0 %v60_v23 }
  0x1e   :  { %1515 = vmatprep.subr.bf16.mxu0 %v61_v26 }
  0x21   :  { %1516 = vmatpush3.bf16.msra.mxu0 %v61_v26 }
  0x24   :  { %1518 = vmatmul.mubr.bf16.vlgmr.msra.gmra.mrb[0].mxu0 %v1790_v27 }
  0x25   :  { %1521 = vmatprep.mubr.bf16.mxu0 %v1791_v28 }
  0x2c   :  { %1522 = vmatmul.mubr.bf16.gmra.mrb[4].mxu0 %v1792_v29 }
  0x2d   :  { %1525 = vmatprep.mubr.bf16.mxu0 %v1793_v30 }
  0x34   :  { %1526 = vmatmul.mubr.bf16.gmra.mrb[8].mxu0 %v1794_v31 }
  0x35   :  { %1529 = vmatprep.mubr.bf16.mxu0 %v1795_v32 }
  0x3c   :  { %1530 = vmatmul.mubr.bf16.gmra.mrb[12].mxu0 %v1796_v33 }
  0x76   :  { %v1699_v34 = vpop.permute.xlu0 %1698 }
  0x77   :  { %v1701_v35 = vunpack.i.h.bf16 %v1699_v34  ;;  %v1700_v36 = vunpack.i.l.bf16 %v1699_v34 }
  0x78   :  { %v1709_v27 = vpop.permute.xlu1 %1708 }
  0x79   :  { %v1650_v38 = vpack.c.bf16 %v1701_v35, %v1700_v36  ;;  %v1711_v29 = vunpack.i.h.bf16 %v1709_v27  ;;  %v1710_v30 = vunpack.i.l.bf16 %v1709_v27 }
  0x7a   :  { %v1704_v39 = vpop.permute.xlu0 %1703 }
  0x7b   :  { %v1706_v40 = vunpack.i.h.bf16 %v1704_v39  ;;  %v1705_v41 = vunpack.i.l.bf16 %v1704_v39  ;;  %1651 = vmatprep.subr.bf16.mxu1 %v1650_v38  ;;  %v1658_v36 = vpack.c.bf16 %v1711_v29, %v1710_v30 }
  0x7c   :  { %1653 = vmatpush3.bf16.msra.mxu1 %v1650_v38 }
  0x7d   :  { %v1654_v42 = vpack.c.bf16 %v1706_v40, %v1705_v41  ;;  %v1714_v40 = vpop.permute.xlu1 %1713 }
  0x7e   :  { %v1716_v41 = vunpack.i.h.bf16 %v1714_v40 }
  0x7f   :  { %1655 = vmatprep.subr.bf16.mxu1 %v1654_v42 }
  0x80   :  { %1657 = vmatpush3.bf16.msra.mxu1 %v1654_v42  ;;  %v1715_v42 = vunpack.i.l.bf16 %v1714_v40 }
  0x81   :  { %1659 = vmatprep.subr.bf16.mxu1 %v1658_v36 }
  0xf7   :  { %v1519_v45 = vpop.f32.mrb[0].mxu0 }
  0xf8   :  { %v167_v46 = vpop.f32.mrb[1].mxu0  ;;  %v176_v49 = vadd.f32 %v1519_v45, %v1965_v37 }
  0xf9   :  { %v168_v47 = vadd.f32 %v1965_v37, %v167_v46  ;;  %v1520_v48 = vpop.f32.mrb[2].mxu0  ;;  %v1662_v46 = vpack.c.bf16 %v1716_v41, %v1715_v42 }
  0xfa   :  { %v170_v50 = vpop.f32.mrb[3].mxu0  ;;  %v179_v53 = vadd.f32 %v1520_v48, %v1965_v37  ;;  %v232_v55 = vmax.f32 %v176_v49, 0.0  ;;  %v2009_v48 = vld [vmem:[%s2375_s7 + $0x81] ss:$0 sm:$0xff]  ;;  %v264_v49 = vpop.permute.xlu0 %263 }
  0xfb   :  { %v230_v51 = vmax.f32 %v168_v47, 0.0  ;;  %v171_v52 = vadd.f32 %v1965_v37, %v170_v50  ;;  %709 = vrot.lane.b32.xlu0 %v2009_v48, %s1798_s14 }
  0xfc   :  { %v233_v58 = vmax.f32 %v179_v53, 0.0 }
  0xfd   :  { %v231_v54 = vmax.f32 %v171_v52, 0.0  ;;  %1541 = vmatprep.mubr.msk.f32.mxu1 %vm266_vm0, %v230_v51 }
  0xff   :  { %v1523_v56 = vpop.f32.mrb[4].mxu0  ;;  %1542 = vmatmul.mubr.msk.f32.vlgmr.msra.gmra.mrb[0].mxu1 %vm266_vm0, %v231_v54 }
 0x100   :  { %v183_v57 = vpop.f32.mrb[5].mxu0  ;;  %1544 = vmatprep.mubr.msk.f32.mxu1 %vm266_vm0, %v232_v55  ;;  %v192_v61 = vadd.f32 %v1523_v56, %v1965_v37  ;;  %1661 = vmatpush3.bf16.msra.mxu1 %v1658_v36 }
 0x101   :  { %v184_v59 = vadd.f32 %v1965_v37, %v183_v57  ;;  %v1524_v60 = vpop.f32.mrb[6].mxu0  ;;  %1663 = vmatprep.subr.bf16.mxu1 %v1662_v46 }
 0x102   :  { %v186_v62 = vpop.f32.mrb[7].mxu0  ;;  %v195_v1 = vadd.f32 %v1524_v60, %v1965_v37  ;;  %v236_v3 = vmax.f32 %v192_v61, 0.0 }
 0x103   :  { %v234_v63 = vmax.f32 %v184_v59, 0.0  ;;  %v187_v0 = vadd.f32 %v1965_v37, %v186_v62  ;;  %1545 = vmatmul.mubr.msk.f32.gmra.mrb[2].mxu1 %vm266_vm0, %v233_v58 }
 0x104   :  { %v237_v7 = vmax.f32 %v195_v1, 0.0  ;;  %1665 = vmatpush3.bf16.msra.mxu1 %v1662_v46 }
 0x105   :  { %v235_v2 = vmax.f32 %v187_v0, 0.0  ;;  %1547 = vmatprep.mubr.msk.f32.mxu1 %vm266_vm0, %v234_v63 }
 0x107   :  { %v1527_v4 = vpop.f32.mrb[8].mxu0  ;;  %1548 = vmatmul.mubr.msk.f32.gmra.mrb[4].mxu1 %vm266_vm0, %v235_v2 }
 0x108   :  { %v199_v6 = vpop.f32.mrb[9].mxu0  ;;  %1550 = vmatprep.mubr.msk.f32.mxu1 %vm266_vm0, %v236_v3  ;;  %v208_v11 = vadd.f32 %v1527_v4, %v1965_v37 }
 0x109   :  { %v200_v8 = vadd.f32 %v1965_v37, %v199_v6  ;;  %v1528_v10 = vpop.f32.mrb[10].mxu0 }
 0x10a   :  { %v202_v12 = vpop.f32.mrb[11].mxu0  ;;  %v211_v17 = vadd.f32 %v1528_v10, %v1965_v37  ;;  %v240_v23 = vmax.f32 %v208_v11, 0.0 }
 0x10b   :  { %v238_v13 = vmax.f32 %v200_v8, 0.0  ;;  %v203_v14 = vadd.f32 %v1965_v37, %v202_v12  ;;  %1551 = vmatmul.mubr.msk.f32.gmra.mrb[6].mxu1 %vm266_vm0, %v237_v7 }
 0x10c   :  { %v241_v31 = vmax.f32 %v211_v17, 0.0 }
 0x10d   :  { %v239_v20 = vmax.f32 %v203_v14, 0.0  ;;  %1553 = vmatprep.mubr.msk.f32.mxu1 %vm266_vm0, %v238_v13 }
 0x10f   :  { %v1531_v26 = vpop.f32.mrb[12].mxu0  ;;  %1554 = vmatmul.mubr.msk.f32.gmra.mrb[8].mxu1 %vm266_vm0, %v239_v20 }
 0x110   :  { %v215_v28 = vpop.f32.mrb[13].mxu0  ;;  %1556 = vmatprep.mubr.msk.f32.mxu1 %vm266_vm0, %v240_v23  ;;  %v224_v34 = vadd.f32 %v1531_v26, %v1965_v37 }
 0x111   :  { %v216_v32 = vadd.f32 %v1965_v37, %v215_v28  ;;  %v1532_v33 = vpop.f32.mrb[14].mxu0 }
 0x112   :  { %v218_v35 = vpop.f32.mrb[15].mxu0  ;;  %v227_v43 = vadd.f32 %v1532_v33, %v1965_v37  ;;  %v244_v45 = vmax.f32 %v224_v34, 0.0 }
 0x113   :  { %v242_v38 = vmax.f32 %v216_v32, 0.0  ;;  %v219_v39 = vadd.f32 %v1965_v37, %v218_v35  ;;  %1557 = vmatmul.mubr.msk.f32.gmra.mrb[10].mxu1 %vm266_vm0, %v241_v31 }
 0x114   :  { %v245_v47 = vmax.f32 %v227_v43, 0.0 }
 0x115   :  { %v243_v44 = vmax.f32 %v219_v39, 0.0  ;;  %1559 = vmatprep.mubr.msk.f32.mxu1 %vm266_vm0, %v242_v38 }
 0x117   :  { %1560 = vmatmul.mubr.msk.f32.gmra.mrb[12].mxu1 %vm266_vm0, %v243_v44 }
 0x118   :  { %1562 = vmatprep.mubr.msk.f32.mxu1 %vm266_vm0, %v244_v45  ;;  %v2111_v45 = vpop.permute.xlu1 %492 }
 0x11b   :  { %1563 = vmatmul.mubr.msk.f32.gmra.mrb[14].mxu1 %vm266_vm0, %v245_v47 }
 0x1d2   :  { %v1543_v50 = vpop.f32.mrb[0].mxu1 }
 0x1d3   :  { %v2015_v51 = vadd.f32 %v1543_v50, %v264_v49  ;;  %v381_v52 = vpop.f32.mrb[1].mxu1 }
 0x1d4   :  { %v2017_v53 = vadd.f32 %v381_v52, %v264_v49  ;;  %v2115_v52 = vpop.permute.xlu0 %709 }
 0x1d5   :  { %v461_v56 = vmax.f32 %v2015_v51, 0.0 }
 0x1d6   :  { %v460_v54 = vmax.f32 %v2017_v53, 0.0  ;;  %v1546_v55 = vpop.f32.mrb[2].mxu1 }
 0x1d7   :  { %v2021_v57 = vadd.f32 %v1546_v55, %v264_v49  ;;  %v391_v58 = vpop.f32.mrb[3].mxu1 }
 0x1d8   :  { %v2023_v59 = vadd.f32 %v391_v58, %v264_v49  ;;  %1573 = vmatprep.mubr.msk.f32.mxu1 %vm266_vm0, %v460_v54 }
 0x1d9   :  { %1574 = vmatmul.mubr.msk.f32.vlgmr.msra.gmra.mrb[16].mxu1 %vm266_vm0, %v461_v56  ;;  %v463_v62 = vmax.f32 %v2021_v57, 0.0 }
 0x1da   :  { %v462_v60 = vmax.f32 %v2023_v59, 0.0  ;;  %v1549_v61 = vpop.f32.mrb[4].mxu1 }
 0x1db   :  { %v2033_v63 = vadd.f32 %v1549_v61, %v264_v49  ;;  %v401_v0 = vpop.f32.mrb[5].mxu1 }
 0x1dc   :  { %v2035_v1 = vadd.f32 %v401_v0, %v264_v49  ;;  %1576 = vmatprep.mubr.msk.f32.mxu1 %vm266_vm0, %v462_v60 }
 0x1dd   :  { %1577 = vmatmul.mubr.msk.f32.gmra.mrb[18].mxu1 %vm266_vm0, %v463_v62  ;;  %v465_v4 = vmax.f32 %v2033_v63, 0.0 }
 0x1de   :  { %v464_v2 = vmax.f32 %v2035_v1, 0.0  ;;  %v1552_v3 = vpop.f32.mrb[6].mxu1 }
 0x1df   :  { %v2045_v6 = vadd.f32 %v1552_v3, %v264_v49  ;;  %v411_v7 = vpop.f32.mrb[7].mxu1 }
 0x1e0   :  { %v2047_v8 = vadd.f32 %v411_v7, %v264_v49  ;;  %1579 = vmatprep.mubr.msk.f32.mxu1 %vm266_vm0, %v464_v2 }
 0x1e1   :  { %1580 = vmatmul.mubr.msk.f32.gmra.mrb[20].mxu1 %vm266_vm0, %v465_v4  ;;  %v467_v12 = vmax.f32 %v2045_v6, 0.0 }
 0x1e2   :  { %v466_v10 = vmax.f32 %v2047_v8, 0.0  ;;  %v1555_v11 = vpop.f32.mrb[8].mxu1  ;;  %v896_v8 = vlaneseq }
 0x1e3   :  { %v2057_v13 = vadd.f32 %v1555_v11, %v264_v49  ;;  %v421_v14 = vpop.f32.mrb[9].mxu1 }
 0x1e4   :  { %v2059_v17 = vadd.f32 %v421_v14, %v264_v49  ;;  %1582 = vmatprep.mubr.msk.f32.mxu1 %vm266_vm0, %v466_v10 }
 0x1e5   :  { %1583 = vmatmul.mubr.msk.f32.gmra.mrb[22].mxu1 %vm266_vm0, %v467_v12  ;;  %v469_v26 = vmax.f32 %v2057_v13, 0.0 }
 0x1e6   :  { %v468_v20 = vmax.f32 %v2059_v17, 0.0  ;;  %v1558_v23 = vpop.f32.mrb[10].mxu1  ;;  %v897_v17 = vshrl.u32 %v896_v8, 7 }
 0x1e7   :  { %v2069_v27 = vadd.f32 %v1558_v23, %v264_v49  ;;  %v431_v28 = vpop.f32.mrb[11].mxu1 }
 0x1e8   :  { %v2071_v29 = vadd.f32 %v431_v28, %v264_v49  ;;  %1585 = vmatprep.mubr.msk.f32.mxu1 %vm266_vm0, %v468_v20 }
 0x1e9   :  { %1586 = vmatmul.mubr.msk.f32.gmra.mrb[24].mxu1 %vm266_vm0, %v469_v26  ;;  %v471_v32 = vmax.f32 %v2069_v27, 0.0 }
 0x1ea   :  { %v470_v30 = vmax.f32 %v2071_v29, 0.0  ;;  %v1561_v31 = vpop.f32.mrb[12].mxu1  ;;  %v898_v29 = vadd.s32 8, %v897_v17 }
 0x1eb   :  { %v2081_v33 = vadd.f32 %v1561_v31, %v264_v49  ;;  %v441_v34 = vpop.f32.mrb[13].mxu1 }
 0x1ec   :  { %v2083_v35 = vadd.f32 %v441_v34, %v264_v49  ;;  %1588 = vmatprep.mubr.msk.f32.mxu1 %vm266_vm0, %v470_v30 }
 0x1ed   :  { %1589 = vmatmul.mubr.msk.f32.gmra.mrb[26].mxu1 %vm266_vm0, %v471_v32  ;;  %v473_v39 = vmax.f32 %v2081_v33, 0.0 }
 0x1ee   :  { %v472_v36 = vmax.f32 %v2083_v35, 0.0  ;;  %v1564_v38 = vpop.f32.mrb[14].mxu1 }
 0x1ef   :  { %v2093_v40 = vadd.f32 %v1564_v38, %v264_v49  ;;  %v451_v41 = vpop.f32.mrb[15].mxu1 }
 0x1f0   :  { %v2095_v42 = vadd.f32 %v451_v41, %v264_v49  ;;  %1591 = vmatprep.mubr.msk.f32.mxu1 %vm266_vm0, %v472_v36 }
 0x1f1   :  { %1592 = vmatmul.mubr.msk.f32.gmra.mrb[28].mxu1 %vm266_vm0, %v473_v39  ;;  %v475_v44 = vmax.f32 %v2093_v40, 0.0  ;;  %v1802_v40 = vmov 1.0|1.0  }
 0x1f2   :  { %v474_v43 = vmax.f32 %v2095_v42, 0.0  ;;  %v2296_v42 = vld [vmem:[%s2379_s3] sm:$0xff] }
 0x1f4   :  { %1594 = vmatprep.mubr.msk.f32.mxu1 %vm266_vm0, %v474_v43 }
 0x1f5   :  { %1595 = vmatmul.mubr.msk.f32.gmra.mrb[30].mxu1 %vm266_vm0, %v475_v44 }
 0x2ac   :  { %v1575_v46 = vpop.f32.mrb[16].mxu1 }
 0x2ad   :  { %v615_v47 = vadd.f32 %v1575_v46, %v2111_v45  ;;  %v609_v49 = vpop.f32.mrb[17].mxu1 }
 0x2ae   :  { %v610_v50 = vadd.f32 %v609_v49, %v2111_v45 }
 0x2af   :  { %v689_v55 = vmax.f32 %v615_v47, 0.0 }
 0x2b0   :  { %v688_v58 = vmax.f32 %v610_v50, 0.0  ;;  %v1578_v61 = vpop.f32.mrb[18].mxu1 }
 0x2b1   :  { %v625_v0 = vadd.f32 %v1578_v61, %v2111_v45  ;;  %v619_v3 = vpop.f32.mrb[19].mxu1  ;;  %v713_v7 = vmul.f32 %v2115_v52, %v689_v55 }
 0x2b2   :  { %v620_v11 = vadd.f32 %v619_v3, %v2111_v45  ;;  %v712_v14 = vmul.f32 %v2115_v52, %v688_v58 }
 0x2b3   :  { %v691_v23 = vmax.f32 %v625_v0, 0.0  ;;  %v731_v28 = vsel %vm266_vm0, %v713_v7, 0.0 }
 0x2b4   :  { %v690_v31 = vmax.f32 %v620_v11, 0.0  ;;  %732 = vadd.xlane.f32.xlu0 %v731_v28  ;;  %v1581_v34 = vpop.f32.mrb[20].mxu1  ;;  %v728_v38 = vsel %vm266_vm0, %v712_v14, 0.0 }
 0x2b5   :  { %v635_v41 = vadd.f32 %v1581_v34, %v2111_v45  ;;  %v629_v46 = vpop.f32.mrb[21].mxu1  ;;  %729 = vadd.xlane.f32.xlu1 %v728_v38  ;;  %v715_v47 = vmul.f32 %v2115_v52, %v691_v23 }
 0x2b6   :  { %v630_v49 = vadd.f32 %v629_v46, %v2111_v45  ;;  %v714_v50 = vmul.f32 %v2115_v52, %v690_v31 }
 0x2b7   :  { %v693_v55 = vmax.f32 %v635_v41, 0.0  ;;  %v737_v58 = vsel %vm266_vm0, %v715_v47, 0.0 }
 0x2b8   :  { %v692_v61 = vmax.f32 %v630_v49, 0.0  ;;  %v1584_v0 = vpop.f32.mrb[22].mxu1  ;;  %v734_v3 = vsel %vm266_vm0, %v714_v50, 0.0 }
 0x2b9   :  { %v645_v7 = vadd.f32 %v1584_v0, %v2111_v45  ;;  %v639_v11 = vpop.f32.mrb[23].mxu1  ;;  %735 = vadd.xlane.f32.xlu0 %v734_v3  ;;  %738 = vadd.xlane.f32.xlu1 %v737_v58  ;;  %v717_v14 = vmul.f32 %v2115_v52, %v693_v55 }
 0x2ba   :  { %v640_v23 = vadd.f32 %v639_v11, %v2111_v45  ;;  %v716_v28 = vmul.f32 %v2115_v52, %v692_v61 }
 0x2bb   :  { %v695_v34 = vmax.f32 %v645_v7, 0.0  ;;  %v743_v31 = vsel %vm266_vm0, %v717_v14, 0.0 }
 0x2bc   :  { %v694_v38 = vmax.f32 %v640_v23, 0.0  ;;  %v1587_v41 = vpop.f32.mrb[24].mxu1  ;;  %v740_v46 = vsel %vm266_vm0, %v716_v28, 0.0 }
 0x2bd   :  { %v655_v47 = vadd.f32 %v1587_v41, %v2111_v45  ;;  %v649_v49 = vpop.f32.mrb[25].mxu1  ;;  %741 = vadd.xlane.f32.xlu0 %v740_v46  ;;  %744 = vadd.xlane.f32.xlu1 %v743_v31  ;;  %v719_v50 = vmul.f32 %v2115_v52, %v695_v34 }
 0x2be   :  { %v650_v55 = vadd.f32 %v649_v49, %v2111_v45  ;;  %v718_v58 = vmul.f32 %v2115_v52, %v694_v38 }
 0x2bf   :  { %v697_v0 = vmax.f32 %v655_v47, 0.0  ;;  %v749_v61 = vsel %vm266_vm0, %v719_v50, 0.0 }
 0x2c0   :  { %v696_v3 = vmax.f32 %v650_v55, 0.0  ;;  %v1590_v7 = vpop.f32.mrb[26].mxu1  ;;  %v746_v11 = vsel %vm266_vm0, %v718_v58, 0.0 }
 0x2c1   :  { %v665_v14 = vadd.f32 %v1590_v7, %v2111_v45  ;;  %v659_v23 = vpop.f32.mrb[27].mxu1  ;;  %747 = vadd.xlane.f32.xlu0 %v746_v11  ;;  %750 = vadd.xlane.f32.xlu1 %v749_v61  ;;  %v721_v28 = vmul.f32 %v2115_v52, %v697_v0 }
 0x2c2   :  { %v660_v34 = vadd.f32 %v659_v23, %v2111_v45  ;;  %v720_v31 = vmul.f32 %v2115_v52, %v696_v3 }
 0x2c3   :  { %v699_v41 = vmax.f32 %v665_v14, 0.0  ;;  %v755_v38 = vsel %vm266_vm0, %v721_v28, 0.0 }
 0x2c4   :  { %v698_v46 = vmax.f32 %v660_v34, 0.0  ;;  %v1593_v47 = vpop.f32.mrb[28].mxu1  ;;  %v752_v49 = vsel %vm266_vm0, %v720_v31, 0.0 }
 0x2c5   :  { %v675_v50 = vadd.f32 %v1593_v47, %v2111_v45  ;;  %v669_v55 = vpop.f32.mrb[29].mxu1  ;;  %753 = vadd.xlane.f32.xlu0 %v752_v49  ;;  %756 = vadd.xlane.f32.xlu1 %v755_v38  ;;  %v723_v58 = vmul.f32 %v2115_v52, %v699_v41 }
 0x2c6   :  { %v670_v0 = vadd.f32 %v669_v55, %v2111_v45  ;;  %v722_v61 = vmul.f32 %v2115_v52, %v698_v46 }
 0x2c7   :  { %v701_v7 = vmax.f32 %v675_v50, 0.0  ;;  %v761_v3 = vsel %vm266_vm0, %v723_v58, 0.0 }
 0x2c8   :  { %v700_v11 = vmax.f32 %v670_v0, 0.0  ;;  %v1596_v14 = vpop.f32.mrb[30].mxu1  ;;  %v758_v23 = vsel %vm266_vm0, %v722_v61, 0.0 }
 0x2c9   :  { %v685_v28 = vadd.f32 %v1596_v14, %v2111_v45  ;;  %v679_v34 = vpop.f32.mrb[31].mxu1  ;;  %759 = vadd.xlane.f32.xlu0 %v758_v23  ;;  %762 = vadd.xlane.f32.xlu1 %v761_v3  ;;  %v725_v31 = vmul.f32 %v2115_v52, %v701_v7  ;;  %v777_v7 = vld [vmem:[%s2377_s2 + $0x8] sm:$0xff]  ;;  %v776_v3 = vld [vmem:[%s2377_s2] sm:$0xff] }
 0x2ca   :  { %v680_v41 = vadd.f32 %v679_v34, %v2111_v45  ;;  %v724_v38 = vmul.f32 %v2115_v52, %v700_v11  ;;  %v1799_v45 = vmov 0.0   ;;  %v779_v34 = vld [vmem:[%s2377_s2 + $0x18] sm:$0xff] }
 0x2cb   :  { %v703_v47 = vmax.f32 %v685_v28, 0.0  ;;  %v767_v46 = vsel %vm266_vm0, %v725_v31, 0.0  ;;  %1597 = vmatprep.subr.bf16.mxu0 %v1799_v45  ;;  %v778_v28 = vld [vmem:[%s2377_s2 + $0x10] sm:$0xff]  ;;  %1613 = vmatprep.mubr.msk.bf16.mxu0 %vm1801_vm1, %v1799_v45  ;;  %35 = vst.msk [vmem:[#allocation2] sm:$0xff] %vm34_vm2, %v1799_v45 }
 0x2cc   :  { %v702_v49 = vmax.f32 %v680_v41, 0.0  ;;  %v764_v50 = vsel %vm266_vm0, %v724_v38, 0.0  ;;  %37 = vst.msk [vmem:[#allocation2 + $0x8] sm:$0x3] %vm36_vm6, %v1799_v45 }
 0x2cd   :  { %765 = vadd.xlane.f32.xlu0 %v764_v50  ;;  %768 = vadd.xlane.f32.xlu1 %v767_v46  ;;  %v727_v55 = vmul.f32 %v2115_v52, %v703_v47  ;;  %v781_v50 = vld [vmem:[%s2377_s2 + $0x28] sm:$0xff] }
 0x2ce   :  { %v726_v58 = vmul.f32 %v2115_v52, %v702_v49  ;;  %v780_v49 = vld [vmem:[%s2377_s2 + $0x20] sm:$0xff] }
 0x2cf   :  { %v773_v0 = vsel %vm266_vm0, %v727_v55, 0.0 }
 0x2d0   :  { %v770_v61 = vsel %vm266_vm0, %v726_v58, 0.0 }
 0x2d1   :  { %771 = vadd.xlane.f32.xlu0 %v770_v61  ;;  %774 = vadd.xlane.f32.xlu1 %v773_v0 }
 0x341   :  { %v733_v11 = vpop.xlane.xlu0 %732 }
 0x342   :  { %v793_v14 = vmul.f32 %v777_v7, %v733_v11  ;;  %v730_v52 = vpop.xlane.xlu1 %729  ;;  %v783_v11 = vld [vmem:[%s2377_s2 + $0x38] sm:$0xff] }
 0x343   :  { %v792_v23 = vmul.f32 %v776_v3, %v730_v52  ;;  %v782_v3 = vld [vmem:[%s2377_s2 + $0x30] sm:$0xff] }
 0x345   :  { %v1717_v31 = vpack.i.bf16 %v793_v14, %v792_v23 }
 0x346   :  { %v736_v41 = vpop.xlane.xlu0 %735  ;;  %v739_v38 = vpop.xlane.xlu1 %738 }
 0x347   :  { %v794_v47 = vmul.f32 %v778_v28, %v736_v41  ;;  %v795_v46 = vmul.f32 %v779_v34, %v739_v38  ;;  %1718 = vrot.lane.b32.xlu0 %v1717_v31, %s1800_s24  ;;  %v784_v31 = vld [vmem:[%s2377_s2 + $0x40] sm:$0xff]  ;;  %v785_v41 = vld [vmem:[%s2377_s2 + $0x48] sm:$0xff] }
 0x349   :  { %v1722_v55 = vpack.i.bf16 %v795_v46, %v794_v47 }
 0x34a   :  { %v742_v58 = vpop.xlane.xlu0 %741  ;;  %v745_v0 = vpop.xlane.xlu1 %744 }
 0x34b   :  { %v796_v61 = vmul.f32 %v780_v49, %v742_v58  ;;  %v797_v7 = vmul.f32 %v781_v50, %v745_v0  ;;  %1723 = vrot.lane.b32.xlu1 %v1722_v55, %s1800_s24  ;;  %v786_v55 = vld [vmem:[%s2377_s2 + $0x50] sm:$0xff]  ;;  %v787_v58 = vld [vmem:[%s2377_s2 + $0x58] sm:$0xff] }
 0x34d   :  { %v1727_v14 = vpack.i.bf16 %v797_v7, %v796_v61 }
 0x34e   :  { %v748_v52 = vpop.xlane.xlu0 %747  ;;  %v751_v23 = vpop.xlane.xlu1 %750 }
 0x34f   :  { %v798_v28 = vmul.f32 %v782_v3, %v748_v52  ;;  %v799_v34 = vmul.f32 %v783_v11, %v751_v23  ;;  %1728 = vrot.lane.b32.xlu1 %v1727_v14, %s1800_s24  ;;  %v788_v14 = vld [vmem:[%s2377_s2 + $0x60] sm:$0xff]  ;;  %v789_v52 = vld [vmem:[%s2377_s2 + $0x68] sm:$0xff] }
 0x351   :  { %v1732_v38 = vpack.i.bf16 %v799_v34, %v798_v28 }
 0x352   :  { %v754_v47 = vpop.xlane.xlu0 %753  ;;  %v757_v46 = vpop.xlane.xlu1 %756 }
 0x353   :  { %v800_v49 = vmul.f32 %v784_v31, %v754_v47  ;;  %v801_v50 = vmul.f32 %v785_v41, %v757_v46  ;;  %1733 = vrot.lane.b32.xlu0 %v1732_v38, %s1800_s24  ;;  %v790_v38 = vld [vmem:[%s2377_s2 + $0x70] sm:$0xff]  ;;  %v791_v47 = vld [vmem:[%s2377_s2 + $0x78] sm:$0xff] }
 0x355   :  { %v1737_v0 = vpack.i.bf16 %v801_v50, %v800_v49 }
 0x356   :  { %v760_v61 = vpop.xlane.xlu0 %759  ;;  %v763_v7 = vpop.xlane.xlu1 %762 }
 0x357   :  { %v802_v3 = vmul.f32 %v786_v55, %v760_v61  ;;  %v803_v11 = vmul.f32 %v787_v58, %v763_v7  ;;  %1738 = vrot.lane.b32.xlu1 %v1737_v0, %s1800_s24  ;;  %v1757_v0 = vpack.i.bf16 %v1901_v16, %v1896_v15  ;;  %v1762_v7 = vpack.i.bf16 %v1913_v19, %v1908_v18 }
 0x359   :  { %v1742_v23 = vpack.i.bf16 %v803_v11, %v802_v3 }
 0x35a   :  { %v766_v28 = vpop.xlane.xlu0 %765  ;;  %v769_v34 = vpop.xlane.xlu1 %768 }
 0x35b   :  { %v804_v31 = vmul.f32 %v788_v14, %v766_v28  ;;  %v805_v41 = vmul.f32 %v789_v52, %v769_v34  ;;  %1743 = vrot.lane.b32.xlu0 %v1742_v23, %s1800_s24 }
 0x35d   :  { %v1747_v46 = vpack.i.bf16 %v805_v41, %v804_v31 }
 0x35e   :  { %v772_v49 = vpop.xlane.xlu0 %771  ;;  %v775_v50 = vpop.xlane.xlu1 %774 }
 0x35f   :  { %v806_v55 = vmul.f32 %v790_v38, %v772_v49  ;;  %v807_v58 = vmul.f32 %v791_v47, %v775_v50  ;;  %1748 = vrot.lane.b32.xlu1 %v1747_v46, %s1800_s24 }
 0x361   :  { %v1752_v61 = vpack.i.bf16 %v807_v58, %v806_v55 }
 0x363   :  { %1753 = vrot.lane.b32.xlu0 %v1752_v61, %s1800_s24  ;;  %1758 = vrot.lane.b32.xlu1 %v1757_v0, %s1797_s17 }
 0x367   :  { %1763 = vrot.lane.b32.xlu0 %v1762_v7, %s1797_s17  ;;  %1768 = vrot.lane.b32.xlu1 %v1861_v5, %s1798_s14 }
 0x36b   :  { %1773 = vrot.lane.b32.xlu0 %v1875_v9, %s1798_s14  ;;  %v2303_v9 = vld [vmem:[%s2379_s3 + $0x8] sm:$0x3] }
 0x3b9   :  { %v1719_v3 = vpop.permute.xlu0 %1718 }
 0x3ba   :  { %v1721_v11 = vunpack.i.h.bf16 %v1719_v3  ;;  %v1720_v14 = vunpack.i.l.bf16 %v1719_v3 }
 0x3bc   :  { %v873_v15 = vsel %vm266_vm0, %v461_v56, %v1721_v11  ;;  %v872_v16 = vsel %vm266_vm0, %v460_v54, %v1720_v14 }
 0x3bd   :  { %v888_v52 = vpack.c.bf16 %v873_v15, %v872_v16  ;;  %v1724_v23 = vpop.permute.xlu1 %1723 }
 0x3be   :  { %v1726_v28 = vunpack.i.h.bf16 %v1724_v23  ;;  %v1725_v34 = vunpack.i.l.bf16 %v1724_v23 }
 0x3bf   :  { %1598 = vmatpush3.bf16.msra.mxu0 %v888_v52 }
 0x3c0   :  { %v875_v18 = vsel %vm266_vm0, %v463_v62, %v1726_v28  ;;  %v874_v19 = vsel %vm266_vm0, %v462_v60, %v1725_v34  ;;  %1599 = vmatprep.subr.bf16.mxu0 %v1799_v45 }
 0x3c1   :  { %v889_v51 = vpack.c.bf16 %v875_v18, %v874_v19  ;;  %v1729_v56 = vpop.permute.xlu1 %1728 }
 0x3c2   :  { %v1731_v53 = vunpack.i.h.bf16 %v1729_v56  ;;  %v1730_v31 = vunpack.i.l.bf16 %v1729_v56 }
 0x3c3   :  { %1600 = vmatpush3.bf16.msra.mxu0 %v889_v51 }
 0x3c4   :  { %v877_v54 = vsel %vm266_vm0, %v465_v4, %v1731_v53  ;;  %v876_v57 = vsel %vm266_vm0, %v464_v2, %v1730_v31  ;;  %1601 = vmatprep.subr.bf16.mxu0 %v1799_v45  ;;  %v911_v53 = vld [vmem:[#allocation2] sm:$0xff] }
 0x3c5   :  { %v890_v59 = vpack.c.bf16 %v877_v54, %v876_v57  ;;  %v1734_v62 = vpop.permute.xlu0 %1733  ;;  %v912_v54 = vld [vmem:[#allocation2 + $0x8] sm:$0x3] }
 0x3c6   :  { %v1736_v60 = vunpack.i.h.bf16 %v1734_v62  ;;  %v1735_v41 = vunpack.i.l.bf16 %v1734_v62 }
 0x3c7   :  { %1602 = vmatpush3.bf16.msra.mxu0 %v890_v59 }
 0x3c8   :  { %v879_v38 = vsel %vm266_vm0, %v467_v12, %v1736_v60  ;;  %v878_v63 = vsel %vm266_vm0, %v466_v10, %v1735_v41  ;;  %1603 = vmatprep.subr.bf16.mxu0 %v1799_v45 }
 0x3c9   :  { %v891_v1 = vpack.c.bf16 %v879_v38, %v878_v63  ;;  %v1739_v4 = vpop.permute.xlu1 %1738 }
 0x3ca   :  { %v1741_v2 = vunpack.i.h.bf16 %v1739_v4  ;;  %v1740_v47 = vunpack.i.l.bf16 %v1739_v4 }
 0x3cb   :  { %1604 = vmatpush3.bf16.msra.mxu0 %v891_v1 }
 0x3cc   :  { %v881_v46 = vsel %vm266_vm0, %v469_v26, %v1741_v2  ;;  %v880_v6 = vsel %vm266_vm0, %v468_v20, %v1740_v47  ;;  %1605 = vmatprep.subr.bf16.mxu0 %v1799_v45 }
 0x3cd   :  { %v892_v12 = vpack.c.bf16 %v881_v46, %v880_v6  ;;  %v1744_v10 = vpop.permute.xlu0 %1743  ;;  %v1777_v46 = vpack.i.bf16 %v1925_v22, %v1920_v21  ;;  %v1782_v6 = vpack.i.bf16 %v1937_v25, %v1932_v24 }
 0x3ce   :  { %v1746_v49 = vunpack.i.h.bf16 %v1744_v10  ;;  %v1745_v50 = vunpack.i.l.bf16 %v1744_v10 }
 0x3cf   :  { %1606 = vmatpush3.bf16.msra.mxu0 %v892_v12 }
 0x3d0   :  { %v883_v55 = vsel %vm266_vm0, %v471_v32, %v1746_v49  ;;  %v882_v13 = vsel %vm266_vm0, %v470_v30, %v1745_v50  ;;  %1607 = vmatprep.subr.bf16.mxu0 %v1799_v45  ;;  %v1406_v30 = vld [vmem:[%s2378_s0] ss:$0 sm:$0xff] }
 0x3d1   :  { %v893_v20 = vpack.c.bf16 %v883_v55, %v882_v13  ;;  %v1749_v26 = vpop.permute.xlu1 %1748  ;;  %vm904_vm3 = vcmp.eq.s32.totalorder %v897_v17, %v1406_v30  ;;  %vm905_vm4 = vcmp.eq.s32.totalorder %v898_v29, %v1406_v30 }
 0x3d2   :  { %v1751_v58 = vunpack.i.h.bf16 %v1749_v26  ;;  %v1750_v0 = vunpack.i.l.bf16 %v1749_v26  ;;  %vm1409_vm5 = vmpackc.low %vm905_vm4, %vm904_vm3 }
 0x3d3   :  { %1608 = vmatpush3.bf16.msra.mxu0 %v893_v20 }
 0x3d4   :  { %v885_v61 = vsel %vm266_vm0, %v473_v39, %v1751_v58  ;;  %v884_v27 = vsel %vm266_vm0, %v472_v36, %v1750_v0  ;;  %1609 = vmatprep.subr.bf16.mxu0 %v1799_v45 }
 0x3d5   :  { %v894_v32 = vpack.c.bf16 %v885_v61, %v884_v27  ;;  %v1754_v7 = vpop.permute.xlu0 %1753  ;;  %v1759_v3 = vpop.permute.xlu1 %1758  ;;  %v1803_v61 = vmov 0  }
 0x3d6   :  { %v1756_v11 = vunpack.i.h.bf16 %v1754_v7  ;;  %v1755_v14 = vunpack.i.l.bf16 %v1754_v7  ;;  %v1761_v15 = vunpack.i.h.bf16 %v1759_v3  ;;  %v1760_v33 = vunpack.i.l.bf16 %v1759_v3  ;;  %1788 = vset.pattern.permute.xlu1 %v1803_v61  ;;  %1787 = vset.pattern.permute.xlu0 %v1803_v61 }
 0x3d7   :  { %1610 = vmatpush3.bf16.msra.mxu0 %v894_v32 }
 0x3d8   :  { %v887_v35 = vsel %vm266_vm0, %v475_v44, %v1756_v11  ;;  %v886_v36 = vsel %vm266_vm0, %v474_v43, %v1755_v14  ;;  %1611 = vmatprep.subr.bf16.mxu0 %v1799_v45  ;;  %v1674_v39 = vpack.c.bf16 %v1761_v15, %v1760_v33 }
 0x3d9   :  { %v895_v16 = vpack.c.bf16 %v887_v35, %v886_v36  ;;  %v1764_v52 = vpop.permute.xlu0 %1763  ;;  %v1769_v43 = vpop.permute.xlu1 %1768 }
 0x3da   :  { %1675 = vmatprep.subr.bf16.mxu1 %v1674_v39  ;;  %v1766_v23 = vunpack.i.h.bf16 %v1764_v52  ;;  %v1765_v28 = vunpack.i.l.bf16 %v1764_v52  ;;  %v1771_v44 = vunpack.i.h.bf16 %v1769_v43  ;;  %v1770_v18 = vunpack.i.l.bf16 %v1769_v43 }
 0x3db   :  { %1612 = vmatpush3.bf16.msra.mxu0 %v895_v16  ;;  %1677 = vmatpush3.bf16.msra.mxu1 %v1674_v39  ;;  %v965_v39 = vld [vmem:[%s2380_s6] sm:$0xff] }
 0x3dc   :  { %v1678_v34 = vpack.c.bf16 %v1766_v23, %v1765_v28  ;;  %v1666_v19 = vpack.c.bf16 %v1771_v44, %v1770_v18  ;;  %v1413_v16 = vld [vmem:[%s2375_s7 + $0x82] ss:$0 sm:$0xff] }
 0x3dd   :  { %v1774_v51 = vpop.permute.xlu0 %1773 }
 0x3de   :  { %1614 = vmatmul.mubr.msk.bf16.vlgmr.msra.gmra.mrb[16].mxu0 %vm1409_vm5, %v1802_v40  ;;  %1679 = vmatprep.subr.bf16.mxu1 %v1678_v34  ;;  %v1776_v45 = vunpack.i.h.bf16 %v1774_v51  ;;  %v1775_v56 = vunpack.i.l.bf16 %v1774_v51 }
 0x3df   :  { %1681 = vmatpush3.bf16.msra.mxu1 %v1678_v34  ;;  %1625 = vmatprep.mubr.msk.f32.mxu0 %vm266_vm0, %v2296_v42 }
 0x3e0   :  { %1667 = vmatprep.subr.bf16.mxu0 %v1666_v19  ;;  %v1670_v5 = vpack.c.bf16 %v1776_v45, %v1775_v56 }
 0x3e1   :  { %1669 = vmatpush3.bf16.msra.mxu0 %v1666_v19 }
 0x3e2   :  { %1671 = vmatprep.subr.bf16.mxu0 %v1670_v5 }
 0x3e5   :  { %1673 = vmatpush3.bf16.msra.mxu0 %v1670_v5  ;;  %v1111_v5 = vld [vmem:[%s2381_s5] sm:$0xff] }
 0x3e8   :  { %1626 = vmatmul.mubr.msk.f32.vlgmr.msra.gmra.mrb[20].mxu0 %vm266_vm0, %v2303_v9 }
 0x4b1   :  { %v947_v31 = vpop.f32.mrb[16].mxu0 }
 0x4b2   :  { %v954_v57 = vadd.f32 %v947_v31, %v911_v53  ;;  %v1615_v59 = vpop.f32.mrb[17].mxu0  ;;  %v1099_v53 = vld [vmem:[%s2382_s4] sm:$0xff] }
 0x4b3   :  { %v950_v62 = vpop.f32.mrb[18].mxu0  ;;  %v1112_v59 = vld [vmem:[%s2381_s5 + $0x8] sm:$0x3] }
 0x4b4   :  { %957 = vst.msk [vmem:[#allocation2] sm:$0xff] %vm34_vm2, %v954_v57  ;;  %v955_v60 = vadd.f32 %v950_v62, %v912_v54  ;;  %v1616_v41 = vpop.f32.mrb[19].mxu0 }
 0x4b6   :  { %959 = vst.msk [vmem:[#allocation2 + $0x8] sm:$0x3] %vm36_vm6, %v955_v60 }
 0x4bb   :  { %v2309_v38 = vld [vmem:[#allocation2] sm:$0xff]  ;;  %v1627_v1 = vpop.f32.mrb[20].mxu0 }
 0x4bc   :  { %1636 = vmatprep.mubr.msk.f32.mxu1 %vm266_vm0, %v2309_v38  ;;  %v1065_v4 = vpop.f32.mrb[21].mxu0 }
 0x4bd   :  { %v2313_v63 = vld [vmem:[#allocation2 + $0x8] sm:$0x3] }
 0x4be   :  { %1637 = vmatmul.mubr.msk.f32.vlgmr.msra.gmra.mrb[32].mxu1 %vm266_vm0, %v2313_v63 }
 0x591   :  { %v1638_v2 = vpop.f32.mrb[32].mxu1 }
 0x592   :  { %1228 = vrot.lane.b32.xlu0 %v1638_v2, %s1800_s24  ;;  %v1215_v47 = vpop.f32.mrb[33].mxu1 }
 0x593   :  { %1226 = vrot.lane.b32.xlu1 %v1215_v47, %s1800_s24 }
 0x596   :  { %1778 = vrot.lane.b32.xlu0 %v1777_v46, %s1797_s17 }
 0x597   :  { %1081 = vrot.lane.b32.xlu1 %v2009_v48, %s1800_s24 }
 0x59b   :  { %1783 = vrot.lane.b32.xlu1 %v1782_v6, %s1797_s17 }
 0x604   :  { %v1229_v8 = vpop.permute.xlu0 %1228 }
 0x605   :  { %v1227_v12 = vpop.permute.xlu1 %1226  ;;  %v1233_v10 = vadd.f32 %v1627_v1, %v1229_v8 }
 0x606   :  { %v1232_v49 = vadd.f32 %v1227_v12, %v1065_v4 }
 0x608   :  { %v1779_v50 = vpop.permute.xlu0 %1778 }
 0x609   :  { %v1082_v55 = vpop.permute.xlu1 %1081  ;;  %v1781_v13 = vunpack.i.h.bf16 %v1779_v50  ;;  %v1780_v21 = vunpack.i.l.bf16 %v1779_v50 }
 0x60a   :  { %v1235_v22 = vadd.f32 %v1233_v10, %v1082_v55  ;;  %v1234_v17 = vadd.f32 %v1232_v49, %v1082_v55 }
 0x60b   :  { %v1682_v20 = vpack.c.bf16 %v1781_v13, %v1780_v21 }
 0x60c   :  { %v1237_v26 = vmax.f32 %v1235_v22, 0.0  ;;  %v1236_v58 = vmax.f32 %v1234_v17, 0.0 }
 0x60d   :  { %v1784_v0 = vpop.permute.xlu1 %1783  ;;  %1683 = vmatprep.subr.bf16.mxu0 %v1682_v20 }
 0x60e   :  { %1242 = vrot.lane.b32.xlu1 %v1237_v26, %s1797_s17  ;;  %1240 = vrot.lane.b32.xlu0 %v1236_v58, %s1797_s17  ;;  %v1786_v24 = vunpack.i.h.bf16 %v1784_v0  ;;  %v1785_v25 = vunpack.i.l.bf16 %v1784_v0 }
 0x60f   :  { %1685 = vmatpush3.bf16.msra.mxu0 %v1682_v20 }
 0x610   :  { %v1686_v27 = vpack.c.bf16 %v1786_v24, %v1785_v25 }
 0x612   :  { %1074 = vrot.lane.b32.xlu0 %v1965_v37, %s1800_s24  ;;  %1687 = vmatprep.subr.bf16.mxu0 %v1686_v27  ;;  %v966_v37 = vld [vmem:[%s2380_s6 + $0x8] sm:$0x3] }
 0x613   :  { %1689 = vmatpush3.bf16.msra.mxu0 %v1686_v27 }
 0x680   :  { %v1243_v29 = vpop.permute.xlu1 %1242  ;;  %v1241_v30 = vpop.permute.xlu0 %1240 }
 0x681   :  { %1647 = vmatprep.mubr.msk.f32.mxu0 %vm266_vm0, %v1241_v30 }
 0x682   :  { %1648 = vmatmul.mubr.msk.f32.vlgmr.msra.gmra.mrb[22].mxu0 %vm266_vm0, %v1243_v29 }
 0x684   :  { %v1075_v32 = vpop.permute.xlu0 %1074 }
 0x685   :  { %v1077_v7 = vadd.f32 %v1075_v32, %v1065_v4  ;;  %v1078_v3 = vadd.f32 %v1627_v1, %v1075_v32 }
 0x687   :  { %v1079_v11 = vmax.f32 %v1077_v7, 0.0  ;;  %v1080_v14 = vmax.f32 %v1078_v3, 0.0 }
 0x689   :  { %v1085_v15 = vmul.f32 %v1082_v55, %v1080_v14  ;;  %v1084_v33 = vmul.f32 %v1082_v55, %v1079_v11 }
 0x68b   :  { %v1090_v35 = vsel %vm1089_vm7, %v1085_v15, 0.0  ;;  %v1086_v36 = vsel %vm266_vm0, %v1084_v33, 0.0 }
 0x68c   :  { %1091 = vadd.xlane.f32.xlu0 %v1090_v35  ;;  %1087 = vadd.xlane.f32.xlu1 %v1086_v36 }
 0x69d   :  { %974 = vperm.xlu1 %1788, %v966_v37  }
 0x6a2   :  { %969 = vperm.xlu0 %1787, %v965_v39  }
 0x719   :  { %v1088_v52 = vpop.xlane.xlu1 %1087  ;;  %v1092_v28 = vpop.xlane.xlu0 %1091 }
 0x71a   :  { %v1097_v23 = vadd.f32 %v1413_v16, %v1088_v52  ;;  %v1098_v34 = vadd.f32 %v1413_v16, %v1092_v28 }
 0x71c   :  { %1115 = vperm.xlu1 %1788, %v1097_v23  }
 0x71d   :  { %v975_v44 = vpop.permute.xlu1 %974 }
 0x71e   :  { %v978_v18 = vmul.f32 %v975_v44, %v2313_v63 }
 0x720   :  { %1120 = vperm.xlu1 %1788, %v1098_v34  }
 0x721   :  { %v970_v40 = vpop.permute.xlu0 %969 }
 0x722   :  { %v977_v43 = vmul.f32 %v970_v40, %v2309_v38 }
 0x724   :  { %1103 = vrot.lane.b32.xlu1 %v977_v43, %s1797_s17 }
 0x728   :  { %1105 = vrot.lane.b32.xlu1 %v978_v18, %s1797_s17 }
 0x72c   :  { %1341 = vrot.lane.b32.xlu1 %v2009_v48, %s1797_s17  ;;  %v1100_v48 = vld [vmem:[%s2382_s4 + $0x8] sm:$0x3] }
 0x755   :  { %v1649_v19 = vpop.f32.mrb[22].mxu0 }
 0x756   :  { %v1330_v51 = vpop.f32.mrb[23].mxu0  ;;  %v1340_v46 = vadd.f32 %v1649_v19, %v2303_v9 }
 0x757   :  { %v1339_v4 = vadd.f32 %v1330_v51, %v2296_v42 }
 0x79b   :  { %v1116_v45 = vpop.permute.xlu1 %1115 }
 0x79c   :  { %v1123_v54 = vmul.f32 %v1116_v45, %v1111_v5 }
 0x79f   :  { %v1121_v56 = vpop.permute.xlu1 %1120 }
 0x7a0   :  { %v1124_v41 = vmul.f32 %v1121_v56, %v1112_v59 }
 0x7a3   :  { %v1104_v31 = vpop.permute.xlu1 %1103 }
 0x7a4   :  { %v1109_v57 = vadd.f32 %v1104_v31, %v1099_v53 }
 0x7a6   :  { %v1125_v62 = vadd.f32 %v1123_v54, %v1109_v57 }
 0x7a7   :  { %v1106_v60 = vpop.permute.xlu1 %1105 }
 0x7a8   :  { %v1110_v38 = vadd.f32 %v1106_v60, %v1100_v48  ;;  %1348 = vrot.lane.b32.xlu1 %v1125_v62, %s1800_s24 }
 0x7aa   :  { %v1126_v63 = vadd.f32 %v1124_v41, %v1110_v38 }
 0x7ab   :  { %v1342_v1 = vpop.permute.xlu1 %1341 }
 0x7ac   :  { %1350 = vrot.lane.b32.xlu1 %v1126_v63, %s1800_s24  ;;  %v1344_v2 = vadd.f32 %v1342_v1, %v1339_v4  ;;  %v1345_v12 = vadd.f32 %v1342_v1, %v1340_v46 }
 0x81a   :  { %v1349_v47 = vpop.permute.xlu1 %1348 }
 0x81b   :  { %v1354_v6 = vsel %vm266_vm0, %v1344_v2, %v1349_v47 }
 0x81c   :  { %v1356_v8 = vsel %vm34_vm2, %v1354_v6, 0.0 }
 0x81d   :  { %1358 = vst [vmem:[%s2383_s8] sm:$0xff] %v1356_v8 }
 0x81e   :  { %v1351_v10 = vpop.permute.xlu1 %1350 }
 0x81f   :  { %v1355_v49 = vsel %vm266_vm0, %v1345_v12, %v1351_v10 }
 0x820   :  { %v1357_v50 = vsel %vm34_vm2, %v1355_v49, 0.0 }
 0x821   :  { %1359 = vst [vmem:[%s2383_s8 + $0x8] sm:$0x3] %v1357_v50 }

</bundles_post_ra>
